<compile_context>
chip_gen: v5e
topology: v5e:2x2
jax: 0.10.0
libtpu: 0.0.40
codegen_flags: <defaults>
</compile_context>

<pallas_src>
import math

import numpy as np

import jax
import jax.numpy as jnp
from jax.experimental import pallas as pl
from jax.experimental.pallas import tpu as pltpu

FILTERS = [1, 32, 32, 64, 64, 128, 128]   # as in the PyTorch module
NUM_LAYERS = len(FILTERS) - 1
_BN_EPS = 1e-5


def _conv_out_size(n):
    # (n - 3 + 2*1) // 2 + 1
    return (n - 1) // 2 + 1


# ----------------------------- Pallas kernels ------------------------------ #

def conv_stack_kernel(x_ref, *refs):
    """All 6 conv+BN+ReLU layers for ONE batch item, fully VMEM-resident.

    refs = (es_1, ms_1, b_1, ..., es_L, ms_L, b_L, out_ref)
      es_l: [3, H_l, H_{l-1}]  bf16 0/1 row-selection (stride-2 + H zero-pad folded)
      ms_l: [3, F_{l-1}, F_l]  bf16 block-Toeplitz mel/kernel-width weights (BN scale folded)
      b_l : [1, F_l]           f32  BN-folded bias (tiled over output mel positions)
    """
    out_ref = refs[-1]
    num_layers = (len(refs) - 1) // 3

    x = x_ref[0]                                        # [H_0, F_0] bf16
    for l in range(num_layers):
        es_ref = refs[3 * l]
        ms_ref = refs[3 * l + 1]
        b_ref = refs[3 * l + 2]
        acc = None
        for k in range(3):                              # 3 kernel-height taps
            # Row selection (stride-2 rows + zero padding) as a tiny 0/1 matmul;
            # exact in bf16, so the cast back to bf16 below is lossless.
            rows = jnp.dot(es_ref[k], x, preferred_element_type=jnp.float32)
            term = jnp.dot(rows.astype(jnp.bfloat16), ms_ref[k],
                           preferred_element_type=jnp.float32)
            acc = term if acc is None else acc + term
        x = jnp.maximum(acc + b_ref[...], 0.0).astype(jnp.bfloat16)

    out_ref[0] = x                                      # [T, F_L], lane-dense (F_L = 128*post_h)


def conv_stack(x, layer_consts):
    """x: [B, H0, F0] bf16.  layer_consts: list of (es, ms, bias).  -> [B, T, F_L] bf16."""
    B, H0, F0 = x.shape
    es_last, ms_last, _ = layer_consts[-1]
    T = es_last.shape[1]
    FL = ms_last.shape[2]

    in_specs = [pl.BlockSpec((1, H0, F0), lambda b: (b, 0, 0))]
    operands = [x]
    for (es, ms, bias) in layer_consts:                 # grid-invariant weights
        in_specs += [
            pl.BlockSpec(es.shape, lambda b: (0, 0, 0)),
            pl.BlockSpec(ms.shape, lambda b: (0, 0, 0)),
            pl.BlockSpec(bias.shape, lambda b: (0, 0)),
        ]
        operands += [es, ms, bias]

    # NOTE: total VMEM use here is ~1.5 MiB at test shapes and ~15 MiB at
    # production mel sizes; set vmem_limit_bytes explicitly if that grows.
    return pl.pallas_call(
        conv_stack_kernel,
        out_shape=jax.ShapeDtypeStruct((B, T, FL), jnp.bfloat16),
        grid=(B,),
        in_specs=in_specs,
        out_specs=pl.BlockSpec((1, T, FL), lambda b: (b, 0, 0)),
        compiler_params=pltpu.CompilerParams(
            dimension_semantics=("parallel",)),         # one batch item per megacore step
    )(*operands)


def gru_kernel(x_ref, wih_ref, bih_ref, whh_ref, bhh_ref, h_out_ref,
               gir_ref, giz_ref, gin_ref):
    TB, E = gir_ref.shape
    B = h_out_ref.shape[0]
    T = TB // B

    # Hoisted input-gate matmul over ALL timesteps (one bf16 MXU matmul, f32 acc);
    # gate split done ONCE, outside the recurrence, into 2D lane-dense scratch.
    gi = jnp.dot(x_ref[...], wih_ref[...], preferred_element_type=jnp.float32)
    gi = gi + bih_ref[...]
    gir_ref[...] = gi[:, 0:E]
    giz_ref[...] = gi[:, E:2 * E]
    gin_ref[...] = gi[:, 2 * E:3 * E]

    bhr = bhh_ref[:, 0:E]
    bhz = bhh_ref[:, E:2 * E]
    bhn = bhh_ref[:, 2 * E:3 * E]

    fused_gates = (E % 128 == 0)          # lane-aligned gate slices are free at E=128
    if fused_gates:
        whh = whh_ref[...]                # [E, 3E] bf16: one MXU push per step
    else:
        whr = whh_ref[:, 0:E]             # per-gate weights: no sub-128-lane result
        whz = whh_ref[:, E:2 * E]         #   slices on the serial recurrent path
        whn = whh_ref[:, 2 * E:3 * E]

    def step(t, h):
        hb = h.astype(jnp.bfloat16)       # bf16 single-pass MXU on the critical path
        gr = gir_ref[pl.ds(t * B, B), :]
        gz = giz_ref[pl.ds(t * B, B), :]
        gn = gin_ref[pl.ds(t * B, B), :]
        if fused_gates:
            gh = jnp.dot(hb, whh, preferred_element_type=jnp.float32)
            ghr, ghz, ghn = gh[:, 0:E], gh[:, E:2 * E], gh[:, 2 * E:3 * E]
        else:
            ghr = jnp.dot(hb, whr, preferred_element_type=jnp.float32)
            ghz = jnp.dot(hb, whz, preferred_element_type=jnp.float32)
            ghn = jnp.dot(hb, whn, preferred_element_type=jnp.float32)
        r = jax.nn.sigmoid(gr + ghr + bhr)
        z = jax.nn.sigmoid(gz + ghz + bhz)
        n = jnp.tanh(gn + r * (ghn + bhn))
        return (1.0 - z) * n + z * h      # PyTorch GRU update

    h0 = jnp.zeros((B, E), jnp.float32)
    h = jax.lax.fori_loop(0, T, step, h0, unroll=min(T, 8))   # capped unroll
    h_out_ref[...] = h


def gru_last_hidden(x_tb, w_ih, b_ih, w_hh, b_hh, B):
    """x_tb: time-major [T*B, Din] (bf16).  Returns final hidden state [B, E] (f32)."""
    TB, Din = x_tb.shape
    E = w_hh.shape[0]
    return pl.pallas_call(
        gru_kernel,
        out_shape=jax.ShapeDtypeStruct((B, E), jnp.float32),
        grid=(1,),
        in_specs=[
            pl.BlockSpec((TB, Din), lambda i: (0, 0)),
            pl.BlockSpec((Din, 3 * E), lambda i: (0, 0)),
            pl.BlockSpec((1, 3 * E), lambda i: (0, 0)),
            pl.BlockSpec((E, 3 * E), lambda i: (0, 0)),
            pl.BlockSpec((1, 3 * E), lambda i: (0, 0)),
        ],
        out_specs=pl.BlockSpec((B, E), lambda i: (0, 0)),
        scratch_shapes=[pltpu.VMEM((TB, E), jnp.float32)] * 3,
        compiler_params=pltpu.CompilerParams(dimension_semantics=("arbitrary",)),
    )(x_tb, w_ih, b_ih, w_hh, b_hh)


# ------------------------------ init / glue -------------------------------- #

def build_row_select_mats(h_in, num_layers):
    """0/1 matrices folding the stride-2 H subsampling + H zero padding of each conv."""
    mats = []
    h_prev = h_in
    for _ in range(num_layers):
        h_out = _conv_out_size(h_prev)
        e = np.zeros((3, h_out, h_prev), np.float32)
        for kh in range(3):
            for ho in range(h_out):
                hi = 2 * ho + kh - 1
                if 0 <= hi < h_prev:
                    e[kh, ho, hi] = 1.0
        mats.append(jnp.asarray(e, dtype=jnp.bfloat16))
        h_prev = h_out
    return mats


def init_params(key, num_mel, embedding_dim):
    bn_scale = 1.0 / math.sqrt(1.0 + _BN_EPS)   # eval-mode BN, default running stats
    params = {"convs": []}
    keys = jax.random.split(key, NUM_LAYERS + 1)
    win = num_mel
    for i in range(NUM_LAYERS):
        cin, cout = FILTERS[i], FILTERS[i + 1]
        wout = _conv_out_size(win)
        k1, k2 = jax.random.split(keys[i])
        fan_in = 9 * cin
        w = np.asarray(jax.random.normal(k1, (3, 3, cin, cout), jnp.float32)) / math.sqrt(fan_in)
        b = np.asarray(jax.random.normal(k2, (cout,), jnp.float32)) * 0.01

        # Fold the mel (width) axis + kernel-width taps into block-Toeplitz matrices:
        # out[ho, wo, co] = sum_kh tap_rows_kh[ho] @ M_kh, built once at init.
        m = np.zeros((3, win * cin, wout * cout), np.float32)
        for kh in range(3):
            for wo in range(wout):
                for kw in range(3):
                    wi = 2 * wo + kw - 1
                    if 0 <= wi < win:
                        m[kh, wi * cin:(wi + 1) * cin, wo * cout:(wo + 1) * cout] = w[kh, kw]
        m *= bn_scale                                           # fold BN scale into weights
        ms = jnp.asarray(m, dtype=jnp.bfloat16)
        bias = jnp.asarray(np.tile(bn_scale * b, wout).reshape(1, wout * cout),
                           dtype=jnp.float32)
        params["convs"].append((ms, bias))
        win = wout

    post_h = win                                   # post_conv_height
    din = FILTERS[-1] * post_h
    E = embedding_dim
    kg = jax.random.split(keys[-1], 4)
    s_i = 1.0 / math.sqrt(din)
    s_h = 1.0 / math.sqrt(E)
    w_ih = (jax.random.normal(kg[0], (din, 3 * E), jnp.float32) * s_i).astype(jnp.bfloat16)
    w_hh = (jax.random.normal(kg[1], (E, 3 * E), jnp.float32) * s_h).astype(jnp.bfloat16)
    b_ih = jax.random.normal(kg[2], (1, 3 * E), jnp.float32) * 0.01
    b_hh = jax.random.normal(kg[3], (1, 3 * E), jnp.float32) * 0.01
    params["gru"] = (w_ih, b_ih, w_hh, b_hh)
    return params


def reference_encoder_forward(inputs, params, num_mel):
    """inputs: [B, num_spec_frames, num_mel] -> [B, embedding_dim]."""
    B = inputs.shape[0]
    # torch: view(B, 1, -1, num_mel) in NCHW; here: [B, time, mel*channels] with C=1.
    x = inputs.reshape(B, -1, num_mel).astype(jnp.bfloat16)
    num_frames = x.shape[1]

    es = build_row_select_mats(num_frames, NUM_LAYERS)     # trace-time 0/1 constants
    layer_consts = [(es[i],) + params["convs"][i] for i in range(NUM_LAYERS)]
    y = conv_stack(x, layer_consts)                        # [B, T, 128*post_h] bf16

    Bc, T, F = y.shape
    xg = jnp.transpose(y, (1, 0, 2)).reshape(T * Bc, F)    # tiny time-major reshuffle
    w_ih, b_ih, w_hh, b_hh = params["gru"]
    return gru_last_hidden(xg, w_ih, b_ih, w_hh, b_hh, Bc)  # [B, E]


# --------------------------------- main ------------------------------------ #

if __name__ == "__main__":
    B = 2
    NUM_FRAMES = 128      # time frames -> 2 GRU steps after 6 stride-2 convs
    NUM_MEL = 16          # mel bins    -> post_conv_height = 1
    EMBEDDING_DIM = 32

    key = jax.random.PRNGKey(0)
    k_in, k_par = jax.random.split(key)
    inputs = jax.random.normal(k_in, (B, NUM_FRAMES, NUM_MEL), jnp.float32)
    params = init_params(k_par, NUM_MEL, EMBEDDING_DIM)

    fwd = jax.jit(reference_encoder_forward, static_argnums=(2,))
    out = fwd(inputs, params, NUM_MEL)
    out = jax.block_until_ready(out)

    assert out.shape == (B, EMBEDDING_DIM), out.shape
    assert bool(jnp.all(jnp.isfinite(out)))
    print("KERNEL_OK")
</pallas_src>

<mosaic_0001>
module attributes {stable_mosaic.version = 11 : i64} {
  func.func @conv_stack_kernel(%arg0: i32, %arg1: memref<1x128x16xbf16, #tpu.memory_space<vmem>>, %arg2: memref<3x64x128xbf16, #tpu.memory_space<vmem>>, %arg3: memref<3x16x256xbf16, #tpu.memory_space<vmem>>, %arg4: memref<1x256xf32, #tpu.memory_space<vmem>>, %arg5: memref<3x32x64xbf16, #tpu.memory_space<vmem>>, %arg6: memref<3x256x128xbf16, #tpu.memory_space<vmem>>, %arg7: memref<1x128xf32, #tpu.memory_space<vmem>>, %arg8: memref<3x16x32xbf16, #tpu.memory_space<vmem>>, %arg9: memref<3x128x128xbf16, #tpu.memory_space<vmem>>, %arg10: memref<1x128xf32, #tpu.memory_space<vmem>>, %arg11: memref<3x8x16xbf16, #tpu.memory_space<vmem>>, %arg12: memref<3x128x64xbf16, #tpu.memory_space<vmem>>, %arg13: memref<1x64xf32, #tpu.memory_space<vmem>>, %arg14: memref<3x4x8xbf16, #tpu.memory_space<vmem>>, %arg15: memref<3x64x128xbf16, #tpu.memory_space<vmem>>, %arg16: memref<1x128xf32, #tpu.memory_space<vmem>>, %arg17: memref<3x2x4xbf16, #tpu.memory_space<vmem>>, %arg18: memref<3x128x128xbf16, #tpu.memory_space<vmem>>, %arg19: memref<1x128xf32, #tpu.memory_space<vmem>>, %arg20: memref<1x2x128xbf16, #tpu.memory_space<vmem>>) attributes {dimension_semantics = [#tpu.dimension_semantics<parallel>], iteration_bounds = array<i64: 2>, scalar_prefetch = 0 : i64, scratch_operands = 0 : i64, tpu.core_type = #tpu.core_type<tc>, window_params = [{transform_indices = @transform_0, window_bounds = array<i64: 1, 128, 16>}, {pipeline_mode = #tpu.pipeline_mode<synchronous>, transform_indices = @transform_1, window_bounds = array<i64: 3, 64, 128>}, {pipeline_mode = #tpu.pipeline_mode<synchronous>, transform_indices = @transform_2, window_bounds = array<i64: 3, 16, 256>}, {pipeline_mode = #tpu.pipeline_mode<synchronous>, transform_indices = @transform_3, window_bounds = array<i64: 1, 256>}, {pipeline_mode = #tpu.pipeline_mode<synchronous>, transform_indices = @transform_4, window_bounds = array<i64: 3, 32, 64>}, {pipeline_mode = #tpu.pipeline_mode<synchronous>, transform_indices = @transform_5, window_bounds = array<i64: 3, 256, 128>}, {pipeline_mode = #tpu.pipeline_mode<synchronous>, transform_indices = @transform_6, window_bounds = array<i64: 1, 128>}, {pipeline_mode = #tpu.pipeline_mode<synchronous>, transform_indices = @transform_7, window_bounds = array<i64: 3, 16, 32>}, {pipeline_mode = #tpu.pipeline_mode<synchronous>, transform_indices = @transform_8, window_bounds = array<i64: 3, 128, 128>}, {pipeline_mode = #tpu.pipeline_mode<synchronous>, transform_indices = @transform_9, window_bounds = array<i64: 1, 128>}, {pipeline_mode = #tpu.pipeline_mode<synchronous>, transform_indices = @transform_10, window_bounds = array<i64: 3, 8, 16>}, {pipeline_mode = #tpu.pipeline_mode<synchronous>, transform_indices = @transform_11, window_bounds = array<i64: 3, 128, 64>}, {pipeline_mode = #tpu.pipeline_mode<synchronous>, transform_indices = @transform_12, window_bounds = array<i64: 1, 64>}, {pipeline_mode = #tpu.pipeline_mode<synchronous>, transform_indices = @transform_13, window_bounds = array<i64: 3, 4, 8>}, {pipeline_mode = #tpu.pipeline_mode<synchronous>, transform_indices = @transform_14, window_bounds = array<i64: 3, 64, 128>}, {pipeline_mode = #tpu.pipeline_mode<synchronous>, transform_indices = @transform_15, window_bounds = array<i64: 1, 128>}, {pipeline_mode = #tpu.pipeline_mode<synchronous>, transform_indices = @transform_16, window_bounds = array<i64: 3, 2, 4>}, {pipeline_mode = #tpu.pipeline_mode<synchronous>, transform_indices = @transform_17, window_bounds = array<i64: 3, 128, 128>}, {pipeline_mode = #tpu.pipeline_mode<synchronous>, transform_indices = @transform_18, window_bounds = array<i64: 1, 128>}, {transform_indices = @transform_19, window_bounds = array<i64: 1, 2, 128>}]} {
    %c0 = arith.constant 0 : index
    %c0_0 = arith.constant 0 : index
    %c0_1 = arith.constant 0 : index
    %0 = vector.load %arg1[%c0, %c0_0, %c0_1] : memref<1x128x16xbf16, #tpu.memory_space<vmem>>, vector<1x128x16xbf16>
    %1 = vector.shape_cast %0 : vector<1x128x16xbf16> to vector<128x16xbf16>
    %c0_2 = arith.constant 0 : index
    %c0_3 = arith.constant 0 : index
    %c0_4 = arith.constant 0 : index
    %2 = vector.load %arg2[%c0_2, %c0_3, %c0_4] : memref<3x64x128xbf16, #tpu.memory_space<vmem>>, vector<1x64x128xbf16>
    %3 = vector.shape_cast %2 : vector<1x64x128xbf16> to vector<64x128xbf16>
    %cst = arith.constant dense<0.000000e+00> : vector<64x16xf32>
    %4 = tpu.matmul %3, %1, %cst {dimension_numbers = #tpu.dot_dimension_numbers<[1], [0], [0], [1], [0, 0, 1, 1], [], []>} : vector<64x128xbf16>, vector<128x16xbf16>, vector<64x16xf32> -> vector<64x16xf32>
    %5 = arith.truncf %4 : vector<64x16xf32> to vector<64x16xbf16>
    %c0_5 = arith.constant 0 : index
    %c0_6 = arith.constant 0 : index
    %c0_7 = arith.constant 0 : index
    %6 = vector.load %arg3[%c0_5, %c0_6, %c0_7] : memref<3x16x256xbf16, #tpu.memory_space<vmem>>, vector<1x16x256xbf16>
    %7 = vector.shape_cast %6 : vector<1x16x256xbf16> to vector<16x256xbf16>
    %cst_8 = arith.constant dense<0.000000e+00> : vector<64x256xf32>
    %8 = tpu.matmul %5, %7, %cst_8 {dimension_numbers = #tpu.dot_dimension_numbers<[1], [0], [0], [1], [0, 0, 1, 1], [], []>} : vector<64x16xbf16>, vector<16x256xbf16>, vector<64x256xf32> -> vector<64x256xf32>
    %c1 = arith.constant 1 : index
    %c0_9 = arith.constant 0 : index
    %c0_10 = arith.constant 0 : index
    %9 = vector.load %arg2[%c1, %c0_9, %c0_10] : memref<3x64x128xbf16, #tpu.memory_space<vmem>>, vector<1x64x128xbf16>
    %10 = vector.shape_cast %9 : vector<1x64x128xbf16> to vector<64x128xbf16>
    %cst_11 = arith.constant dense<0.000000e+00> : vector<64x16xf32>
    %11 = tpu.matmul %10, %1, %cst_11 {dimension_numbers = #tpu.dot_dimension_numbers<[1], [0], [0], [1], [0, 0, 1, 1], [], []>} : vector<64x128xbf16>, vector<128x16xbf16>, vector<64x16xf32> -> vector<64x16xf32>
    %12 = arith.truncf %11 : vector<64x16xf32> to vector<64x16xbf16>
    %c1_12 = arith.constant 1 : index
    %c0_13 = arith.constant 0 : index
    %c0_14 = arith.constant 0 : index
    %13 = vector.load %arg3[%c1_12, %c0_13, %c0_14] : memref<3x16x256xbf16, #tpu.memory_space<vmem>>, vector<1x16x256xbf16>
    %14 = vector.shape_cast %13 : vector<1x16x256xbf16> to vector<16x256xbf16>
    %cst_15 = arith.constant dense<0.000000e+00> : vector<64x256xf32>
    %15 = tpu.matmul %12, %14, %cst_15 {dimension_numbers = #tpu.dot_dimension_numbers<[1], [0], [0], [1], [0, 0, 1, 1], [], []>} : vector<64x16xbf16>, vector<16x256xbf16>, vector<64x256xf32> -> vector<64x256xf32>
    %16 = arith.addf %8, %15 : vector<64x256xf32>
    %c2 = arith.constant 2 : index
    %c0_16 = arith.constant 0 : index
    %c0_17 = arith.constant 0 : index
    %17 = vector.load %arg2[%c2, %c0_16, %c0_17] : memref<3x64x128xbf16, #tpu.memory_space<vmem>>, vector<1x64x128xbf16>
    %18 = vector.shape_cast %17 : vector<1x64x128xbf16> to vector<64x128xbf16>
    %cst_18 = arith.constant dense<0.000000e+00> : vector<64x16xf32>
    %19 = tpu.matmul %18, %1, %cst_18 {dimension_numbers = #tpu.dot_dimension_numbers<[1], [0], [0], [1], [0, 0, 1, 1], [], []>} : vector<64x128xbf16>, vector<128x16xbf16>, vector<64x16xf32> -> vector<64x16xf32>
    %20 = arith.truncf %19 : vector<64x16xf32> to vector<64x16xbf16>
    %c2_19 = arith.constant 2 : index
    %c0_20 = arith.constant 0 : index
    %c0_21 = arith.constant 0 : index
    %21 = vector.load %arg3[%c2_19, %c0_20, %c0_21] : memref<3x16x256xbf16, #tpu.memory_space<vmem>>, vector<1x16x256xbf16>
    %22 = vector.shape_cast %21 : vector<1x16x256xbf16> to vector<16x256xbf16>
    %cst_22 = arith.constant dense<0.000000e+00> : vector<64x256xf32>
    %23 = tpu.matmul %20, %22, %cst_22 {dimension_numbers = #tpu.dot_dimension_numbers<[1], [0], [0], [1], [0, 0, 1, 1], [], []>} : vector<64x16xbf16>, vector<16x256xbf16>, vector<64x256xf32> -> vector<64x256xf32>
    %24 = arith.addf %16, %23 : vector<64x256xf32>
    %c0_23 = arith.constant 0 : index
    %c0_24 = arith.constant 0 : index
    %25 = vector.load %arg4[%c0_23, %c0_24] : memref<1x256xf32, #tpu.memory_space<vmem>>, vector<1x256xf32>
    %26 = vector.broadcast %25 : vector<1x256xf32> to vector<64x256xf32>
    %27 = arith.addf %24, %26 : vector<64x256xf32>
    %cst_25 = arith.constant 0.000000e+00 : f32
    %28 = vector.broadcast %cst_25 : f32 to vector<64x256xf32>
    %29 = arith.maximumf %27, %28 : vector<64x256xf32>
    %30 = arith.truncf %29 : vector<64x256xf32> to vector<64x256xbf16>
    %c0_26 = arith.constant 0 : index
    %c0_27 = arith.constant 0 : index
    %c0_28 = arith.constant 0 : index
    %31 = vector.load %arg5[%c0_26, %c0_27, %c0_28] : memref<3x32x64xbf16, #tpu.memory_space<vmem>>, vector<1x32x64xbf16>
    %32 = vector.shape_cast %31 : vector<1x32x64xbf16> to vector<32x64xbf16>
    %cst_29 = arith.constant dense<0.000000e+00> : vector<32x256xf32>
    %33 = tpu.matmul %32, %30, %cst_29 {dimension_numbers = #tpu.dot_dimension_numbers<[1], [0], [0], [1], [0, 0, 1, 1], [], []>} : vector<32x64xbf16>, vector<64x256xbf16>, vector<32x256xf32> -> vector<32x256xf32>
    %34 = arith.truncf %33 : vector<32x256xf32> to vector<32x256xbf16>
    %c0_30 = arith.constant 0 : index
    %c0_31 = arith.constant 0 : index
    %c0_32 = arith.constant 0 : index
    %35 = vector.load %arg6[%c0_30, %c0_31, %c0_32] : memref<3x256x128xbf16, #tpu.memory_space<vmem>>, vector<1x256x128xbf16>
    %36 = vector.shape_cast %35 : vector<1x256x128xbf16> to vector<256x128xbf16>
    %cst_33 = arith.constant dense<0.000000e+00> : vector<32x128xf32>
    %37 = tpu.matmul %34, %36, %cst_33 {dimension_numbers = #tpu.dot_dimension_numbers<[1], [0], [0], [1], [0, 0, 1, 1], [], []>} : vector<32x256xbf16>, vector<256x128xbf16>, vector<32x128xf32> -> vector<32x128xf32>
    %c1_34 = arith.constant 1 : index
    %c0_35 = arith.constant 0 : index
    %c0_36 = arith.constant 0 : index
    %38 = vector.load %arg5[%c1_34, %c0_35, %c0_36] : memref<3x32x64xbf16, #tpu.memory_space<vmem>>, vector<1x32x64xbf16>
    %39 = vector.shape_cast %38 : vector<1x32x64xbf16> to vector<32x64xbf16>
    %cst_37 = arith.constant dense<0.000000e+00> : vector<32x256xf32>
    %40 = tpu.matmul %39, %30, %cst_37 {dimension_numbers = #tpu.dot_dimension_numbers<[1], [0], [0], [1], [0, 0, 1, 1], [], []>} : vector<32x64xbf16>, vector<64x256xbf16>, vector<32x256xf32> -> vector<32x256xf32>
    %41 = arith.truncf %40 : vector<32x256xf32> to vector<32x256xbf16>
    %c1_38 = arith.constant 1 : index
    %c0_39 = arith.constant 0 : index
    %c0_40 = arith.constant 0 : index
    %42 = vector.load %arg6[%c1_38, %c0_39, %c0_40] : memref<3x256x128xbf16, #tpu.memory_space<vmem>>, vector<1x256x128xbf16>
    %43 = vector.shape_cast %42 : vector<1x256x128xbf16> to vector<256x128xbf16>
    %cst_41 = arith.constant dense<0.000000e+00> : vector<32x128xf32>
    %44 = tpu.matmul %41, %43, %cst_41 {dimension_numbers = #tpu.dot_dimension_numbers<[1], [0], [0], [1], [0, 0, 1, 1], [], []>} : vector<32x256xbf16>, vector<256x128xbf16>, vector<32x128xf32> -> vector<32x128xf32>
    %45 = arith.addf %37, %44 : vector<32x128xf32>
    %c2_42 = arith.constant 2 : index
    %c0_43 = arith.constant 0 : index
    %c0_44 = arith.constant 0 : index
    %46 = vector.load %arg5[%c2_42, %c0_43, %c0_44] : memref<3x32x64xbf16, #tpu.memory_space<vmem>>, vector<1x32x64xbf16>
    %47 = vector.shape_cast %46 : vector<1x32x64xbf16> to vector<32x64xbf16>
    %cst_45 = arith.constant dense<0.000000e+00> : vector<32x256xf32>
    %48 = tpu.matmul %47, %30, %cst_45 {dimension_numbers = #tpu.dot_dimension_numbers<[1], [0], [0], [1], [0, 0, 1, 1], [], []>} : vector<32x64xbf16>, vector<64x256xbf16>, vector<32x256xf32> -> vector<32x256xf32>
    %49 = arith.truncf %48 : vector<32x256xf32> to vector<32x256xbf16>
    %c2_46 = arith.constant 2 : index
    %c0_47 = arith.constant 0 : index
    %c0_48 = arith.constant 0 : index
    %50 = vector.load %arg6[%c2_46, %c0_47, %c0_48] : memref<3x256x128xbf16, #tpu.memory_space<vmem>>, vector<1x256x128xbf16>
    %51 = vector.shape_cast %50 : vector<1x256x128xbf16> to vector<256x128xbf16>
    %cst_49 = arith.constant dense<0.000000e+00> : vector<32x128xf32>
    %52 = tpu.matmul %49, %51, %cst_49 {dimension_numbers = #tpu.dot_dimension_numbers<[1], [0], [0], [1], [0, 0, 1, 1], [], []>} : vector<32x256xbf16>, vector<256x128xbf16>, vector<32x128xf32> -> vector<32x128xf32>
    %53 = arith.addf %45, %52 : vector<32x128xf32>
    %c0_50 = arith.constant 0 : index
    %c0_51 = arith.constant 0 : index
    %54 = vector.load %arg7[%c0_50, %c0_51] : memref<1x128xf32, #tpu.memory_space<vmem>>, vector<1x128xf32>
    %55 = vector.broadcast %54 : vector<1x128xf32> to vector<32x128xf32>
    %56 = arith.addf %53, %55 : vector<32x128xf32>
    %cst_52 = arith.constant 0.000000e+00 : f32
    %57 = vector.broadcast %cst_52 : f32 to vector<32x128xf32>
    %58 = arith.maximumf %56, %57 : vector<32x128xf32>
    %59 = arith.truncf %58 : vector<32x128xf32> to vector<32x128xbf16>
    %c0_53 = arith.constant 0 : index
    %c0_54 = arith.constant 0 : index
    %c0_55 = arith.constant 0 : index
    %60 = vector.load %arg8[%c0_53, %c0_54, %c0_55] : memref<3x16x32xbf16, #tpu.memory_space<vmem>>, vector<1x16x32xbf16>
    %61 = vector.shape_cast %60 : vector<1x16x32xbf16> to vector<16x32xbf16>
    %cst_56 = arith.constant dense<0.000000e+00> : vector<16x128xf32>
    %62 = tpu.matmul %61, %59, %cst_56 {dimension_numbers = #tpu.dot_dimension_numbers<[1], [0], [0], [1], [0, 0, 1, 1], [], []>} : vector<16x32xbf16>, vector<32x128xbf16>, vector<16x128xf32> -> vector<16x128xf32>
    %63 = arith.truncf %62 : vector<16x128xf32> to vector<16x128xbf16>
    %c0_57 = arith.constant 0 : index
    %c0_58 = arith.constant 0 : index
    %c0_59 = arith.constant 0 : index
    %64 = vector.load %arg9[%c0_57, %c0_58, %c0_59] : memref<3x128x128xbf16, #tpu.memory_space<vmem>>, vector<1x128x128xbf16>
    %65 = vector.shape_cast %64 : vector<1x128x128xbf16> to vector<128x128xbf16>
    %cst_60 = arith.constant dense<0.000000e+00> : vector<16x128xf32>
    %66 = tpu.matmul %63, %65, %cst_60 {dimension_numbers = #tpu.dot_dimension_numbers<[1], [0], [0], [1], [0, 0, 1, 1], [], []>} : vector<16x128xbf16>, vector<128x128xbf16>, vector<16x128xf32> -> vector<16x128xf32>
    %c1_61 = arith.constant 1 : index
    %c0_62 = arith.constant 0 : index
    %c0_63 = arith.constant 0 : index
    %67 = vector.load %arg8[%c1_61, %c0_62, %c0_63] : memref<3x16x32xbf16, #tpu.memory_space<vmem>>, vector<1x16x32xbf16>
    %68 = vector.shape_cast %67 : vector<1x16x32xbf16> to vector<16x32xbf16>
    %cst_64 = arith.constant dense<0.000000e+00> : vector<16x128xf32>
    %69 = tpu.matmul %68, %59, %cst_64 {dimension_numbers = #tpu.dot_dimension_numbers<[1], [0], [0], [1], [0, 0, 1, 1], [], []>} : vector<16x32xbf16>, vector<32x128xbf16>, vector<16x128xf32> -> vector<16x128xf32>
    %70 = arith.truncf %69 : vector<16x128xf32> to vector<16x128xbf16>
    %c1_65 = arith.constant 1 : index
    %c0_66 = arith.constant 0 : index
    %c0_67 = arith.constant 0 : index
    %71 = vector.load %arg9[%c1_65, %c0_66, %c0_67] : memref<3x128x128xbf16, #tpu.memory_space<vmem>>, vector<1x128x128xbf16>
    %72 = vector.shape_cast %71 : vector<1x128x128xbf16> to vector<128x128xbf16>
    %cst_68 = arith.constant dense<0.000000e+00> : vector<16x128xf32>
    %73 = tpu.matmul %70, %72, %cst_68 {dimension_numbers = #tpu.dot_dimension_numbers<[1], [0], [0], [1], [0, 0, 1, 1], [], []>} : vector<16x128xbf16>, vector<128x128xbf16>, vector<16x128xf32> -> vector<16x128xf32>
    %74 = arith.addf %66, %73 : vector<16x128xf32>
    %c2_69 = arith.constant 2 : index
    %c0_70 = arith.constant 0 : index
    %c0_71 = arith.constant 0 : index
    %75 = vector.load %arg8[%c2_69, %c0_70, %c0_71] : memref<3x16x32xbf16, #tpu.memory_space<vmem>>, vector<1x16x32xbf16>
    %76 = vector.shape_cast %75 : vector<1x16x32xbf16> to vector<16x32xbf16>
    %cst_72 = arith.constant dense<0.000000e+00> : vector<16x128xf32>
    %77 = tpu.matmul %76, %59, %cst_72 {dimension_numbers = #tpu.dot_dimension_numbers<[1], [0], [0], [1], [0, 0, 1, 1], [], []>} : vector<16x32xbf16>, vector<32x128xbf16>, vector<16x128xf32> -> vector<16x128xf32>
    %78 = arith.truncf %77 : vector<16x128xf32> to vector<16x128xbf16>
    %c2_73 = arith.constant 2 : index
    %c0_74 = arith.constant 0 : index
    %c0_75 = arith.constant 0 : index
    %79 = vector.load %arg9[%c2_73, %c0_74, %c0_75] : memref<3x128x128xbf16, #tpu.memory_space<vmem>>, vector<1x128x128xbf16>
    %80 = vector.shape_cast %79 : vector<1x128x128xbf16> to vector<128x128xbf16>
    %cst_76 = arith.constant dense<0.000000e+00> : vector<16x128xf32>
    %81 = tpu.matmul %78, %80, %cst_76 {dimension_numbers = #tpu.dot_dimension_numbers<[1], [0], [0], [1], [0, 0, 1, 1], [], []>} : vector<16x128xbf16>, vector<128x128xbf16>, vector<16x128xf32> -> vector<16x128xf32>
    %82 = arith.addf %74, %81 : vector<16x128xf32>
    %c0_77 = arith.constant 0 : index
    %c0_78 = arith.constant 0 : index
    %83 = vector.load %arg10[%c0_77, %c0_78] : memref<1x128xf32, #tpu.memory_space<vmem>>, vector<1x128xf32>
    %84 = vector.broadcast %83 : vector<1x128xf32> to vector<16x128xf32>
    %85 = arith.addf %82, %84 : vector<16x128xf32>
    %cst_79 = arith.constant 0.000000e+00 : f32
    %86 = vector.broadcast %cst_79 : f32 to vector<16x128xf32>
    %87 = arith.maximumf %85, %86 : vector<16x128xf32>
    %88 = arith.truncf %87 : vector<16x128xf32> to vector<16x128xbf16>
    %c0_80 = arith.constant 0 : index
    %c0_81 = arith.constant 0 : index
    %c0_82 = arith.constant 0 : index
    %89 = vector.load %arg11[%c0_80, %c0_81, %c0_82] : memref<3x8x16xbf16, #tpu.memory_space<vmem>>, vector<1x8x16xbf16>
    %90 = vector.shape_cast %89 : vector<1x8x16xbf16> to vector<8x16xbf16>
    %cst_83 = arith.constant dense<0.000000e+00> : vector<8x128xf32>
    %91 = tpu.matmul %90, %88, %cst_83 {dimension_numbers = #tpu.dot_dimension_numbers<[1], [0], [0], [1], [0, 0, 1, 1], [], []>} : vector<8x16xbf16>, vector<16x128xbf16>, vector<8x128xf32> -> vector<8x128xf32>
    %92 = arith.truncf %91 : vector<8x128xf32> to vector<8x128xbf16>
    %c0_84 = arith.constant 0 : index
    %c0_85 = arith.constant 0 : index
    %c0_86 = arith.constant 0 : index
    %93 = vector.load %arg12[%c0_84, %c0_85, %c0_86] : memref<3x128x64xbf16, #tpu.memory_space<vmem>>, vector<1x128x64xbf16>
    %94 = vector.shape_cast %93 : vector<1x128x64xbf16> to vector<128x64xbf16>
    %cst_87 = arith.constant dense<0.000000e+00> : vector<8x64xf32>
    %95 = tpu.matmul %92, %94, %cst_87 {dimension_numbers = #tpu.dot_dimension_numbers<[1], [0], [0], [1], [0, 0, 1, 1], [], []>} : vector<8x128xbf16>, vector<128x64xbf16>, vector<8x64xf32> -> vector<8x64xf32>
    %c1_88 = arith.constant 1 : index
    %c0_89 = arith.constant 0 : index
    %c0_90 = arith.constant 0 : index
    %96 = vector.load %arg11[%c1_88, %c0_89, %c0_90] : memref<3x8x16xbf16, #tpu.memory_space<vmem>>, vector<1x8x16xbf16>
    %97 = vector.shape_cast %96 : vector<1x8x16xbf16> to vector<8x16xbf16>
    %cst_91 = arith.constant dense<0.000000e+00> : vector<8x128xf32>
    %98 = tpu.matmul %97, %88, %cst_91 {dimension_numbers = #tpu.dot_dimension_numbers<[1], [0], [0], [1], [0, 0, 1, 1], [], []>} : vector<8x16xbf16>, vector<16x128xbf16>, vector<8x128xf32> -> vector<8x128xf32>
    %99 = arith.truncf %98 : vector<8x128xf32> to vector<8x128xbf16>
    %c1_92 = arith.constant 1 : index
    %c0_93 = arith.constant 0 : index
    %c0_94 = arith.constant 0 : index
    %100 = vector.load %arg12[%c1_92, %c0_93, %c0_94] : memref<3x128x64xbf16, #tpu.memory_space<vmem>>, vector<1x128x64xbf16>
    %101 = vector.shape_cast %100 : vector<1x128x64xbf16> to vector<128x64xbf16>
    %cst_95 = arith.constant dense<0.000000e+00> : vector<8x64xf32>
    %102 = tpu.matmul %99, %101, %cst_95 {dimension_numbers = #tpu.dot_dimension_numbers<[1], [0], [0], [1], [0, 0, 1, 1], [], []>} : vector<8x128xbf16>, vector<128x64xbf16>, vector<8x64xf32> -> vector<8x64xf32>
    %103 = arith.addf %95, %102 : vector<8x64xf32>
    %c2_96 = arith.constant 2 : index
    %c0_97 = arith.constant 0 : index
    %c0_98 = arith.constant 0 : index
    %104 = vector.load %arg11[%c2_96, %c0_97, %c0_98] : memref<3x8x16xbf16, #tpu.memory_space<vmem>>, vector<1x8x16xbf16>
    %105 = vector.shape_cast %104 : vector<1x8x16xbf16> to vector<8x16xbf16>
    %cst_99 = arith.constant dense<0.000000e+00> : vector<8x128xf32>
    %106 = tpu.matmul %105, %88, %cst_99 {dimension_numbers = #tpu.dot_dimension_numbers<[1], [0], [0], [1], [0, 0, 1, 1], [], []>} : vector<8x16xbf16>, vector<16x128xbf16>, vector<8x128xf32> -> vector<8x128xf32>
    %107 = arith.truncf %106 : vector<8x128xf32> to vector<8x128xbf16>
    %c2_100 = arith.constant 2 : index
    %c0_101 = arith.constant 0 : index
    %c0_102 = arith.constant 0 : index
    %108 = vector.load %arg12[%c2_100, %c0_101, %c0_102] : memref<3x128x64xbf16, #tpu.memory_space<vmem>>, vector<1x128x64xbf16>
    %109 = vector.shape_cast %108 : vector<1x128x64xbf16> to vector<128x64xbf16>
    %cst_103 = arith.constant dense<0.000000e+00> : vector<8x64xf32>
    %110 = tpu.matmul %107, %109, %cst_103 {dimension_numbers = #tpu.dot_dimension_numbers<[1], [0], [0], [1], [0, 0, 1, 1], [], []>} : vector<8x128xbf16>, vector<128x64xbf16>, vector<8x64xf32> -> vector<8x64xf32>
    %111 = arith.addf %103, %110 : vector<8x64xf32>
    %c0_104 = arith.constant 0 : index
    %c0_105 = arith.constant 0 : index
    %112 = vector.load %arg13[%c0_104, %c0_105] : memref<1x64xf32, #tpu.memory_space<vmem>>, vector<1x64xf32>
    %113 = vector.broadcast %112 : vector<1x64xf32> to vector<8x64xf32>
    %114 = arith.addf %111, %113 : vector<8x64xf32>
    %cst_106 = arith.constant 0.000000e+00 : f32
    %115 = vector.broadcast %cst_106 : f32 to vector<8x64xf32>
    %116 = arith.maximumf %114, %115 : vector<8x64xf32>
    %117 = arith.truncf %116 : vector<8x64xf32> to vector<8x64xbf16>
    %c0_107 = arith.constant 0 : index
    %c0_108 = arith.constant 0 : index
    %c0_109 = arith.constant 0 : index
    %118 = vector.load %arg14[%c0_107, %c0_108, %c0_109] : memref<3x4x8xbf16, #tpu.memory_space<vmem>>, vector<1x4x8xbf16>
    %119 = vector.shape_cast %118 : vector<1x4x8xbf16> to vector<4x8xbf16>
    %cst_110 = arith.constant dense<0.000000e+00> : vector<4x64xf32>
    %120 = tpu.matmul %119, %117, %cst_110 {dimension_numbers = #tpu.dot_dimension_numbers<[1], [0], [0], [1], [0, 0, 1, 1], [], []>} : vector<4x8xbf16>, vector<8x64xbf16>, vector<4x64xf32> -> vector<4x64xf32>
    %121 = arith.truncf %120 : vector<4x64xf32> to vector<4x64xbf16>
    %c0_111 = arith.constant 0 : index
    %c0_112 = arith.constant 0 : index
    %c0_113 = arith.constant 0 : index
    %122 = vector.load %arg15[%c0_111, %c0_112, %c0_113] : memref<3x64x128xbf16, #tpu.memory_space<vmem>>, vector<1x64x128xbf16>
    %123 = vector.shape_cast %122 : vector<1x64x128xbf16> to vector<64x128xbf16>
    %cst_114 = arith.constant dense<0.000000e+00> : vector<4x128xf32>
    %124 = tpu.matmul %121, %123, %cst_114 {dimension_numbers = #tpu.dot_dimension_numbers<[1], [0], [0], [1], [0, 0, 1, 1], [], []>} : vector<4x64xbf16>, vector<64x128xbf16>, vector<4x128xf32> -> vector<4x128xf32>
    %c1_115 = arith.constant 1 : index
    %c0_116 = arith.constant 0 : index
    %c0_117 = arith.constant 0 : index
    %125 = vector.load %arg14[%c1_115, %c0_116, %c0_117] : memref<3x4x8xbf16, #tpu.memory_space<vmem>>, vector<1x4x8xbf16>
    %126 = vector.shape_cast %125 : vector<1x4x8xbf16> to vector<4x8xbf16>
    %cst_118 = arith.constant dense<0.000000e+00> : vector<4x64xf32>
    %127 = tpu.matmul %126, %117, %cst_118 {dimension_numbers = #tpu.dot_dimension_numbers<[1], [0], [0], [1], [0, 0, 1, 1], [], []>} : vector<4x8xbf16>, vector<8x64xbf16>, vector<4x64xf32> -> vector<4x64xf32>
    %128 = arith.truncf %127 : vector<4x64xf32> to vector<4x64xbf16>
    %c1_119 = arith.constant 1 : index
    %c0_120 = arith.constant 0 : index
    %c0_121 = arith.constant 0 : index
    %129 = vector.load %arg15[%c1_119, %c0_120, %c0_121] : memref<3x64x128xbf16, #tpu.memory_space<vmem>>, vector<1x64x128xbf16>
    %130 = vector.shape_cast %129 : vector<1x64x128xbf16> to vector<64x128xbf16>
    %cst_122 = arith.constant dense<0.000000e+00> : vector<4x128xf32>
    %131 = tpu.matmul %128, %130, %cst_122 {dimension_numbers = #tpu.dot_dimension_numbers<[1], [0], [0], [1], [0, 0, 1, 1], [], []>} : vector<4x64xbf16>, vector<64x128xbf16>, vector<4x128xf32> -> vector<4x128xf32>
    %132 = arith.addf %124, %131 : vector<4x128xf32>
    %c2_123 = arith.constant 2 : index
    %c0_124 = arith.constant 0 : index
    %c0_125 = arith.constant 0 : index
    %133 = vector.load %arg14[%c2_123, %c0_124, %c0_125] : memref<3x4x8xbf16, #tpu.memory_space<vmem>>, vector<1x4x8xbf16>
    %134 = vector.shape_cast %133 : vector<1x4x8xbf16> to vector<4x8xbf16>
    %cst_126 = arith.constant dense<0.000000e+00> : vector<4x64xf32>
    %135 = tpu.matmul %134, %117, %cst_126 {dimension_numbers = #tpu.dot_dimension_numbers<[1], [0], [0], [1], [0, 0, 1, 1], [], []>} : vector<4x8xbf16>, vector<8x64xbf16>, vector<4x64xf32> -> vector<4x64xf32>
    %136 = arith.truncf %135 : vector<4x64xf32> to vector<4x64xbf16>
    %c2_127 = arith.constant 2 : index
    %c0_128 = arith.constant 0 : index
    %c0_129 = arith.constant 0 : index
    %137 = vector.load %arg15[%c2_127, %c0_128, %c0_129] : memref<3x64x128xbf16, #tpu.memory_space<vmem>>, vector<1x64x128xbf16>
    %138 = vector.shape_cast %137 : vector<1x64x128xbf16> to vector<64x128xbf16>
    %cst_130 = arith.constant dense<0.000000e+00> : vector<4x128xf32>
    %139 = tpu.matmul %136, %138, %cst_130 {dimension_numbers = #tpu.dot_dimension_numbers<[1], [0], [0], [1], [0, 0, 1, 1], [], []>} : vector<4x64xbf16>, vector<64x128xbf16>, vector<4x128xf32> -> vector<4x128xf32>
    %140 = arith.addf %132, %139 : vector<4x128xf32>
    %c0_131 = arith.constant 0 : index
    %c0_132 = arith.constant 0 : index
    %141 = vector.load %arg16[%c0_131, %c0_132] : memref<1x128xf32, #tpu.memory_space<vmem>>, vector<1x128xf32>
    %142 = vector.broadcast %141 : vector<1x128xf32> to vector<4x128xf32>
    %143 = arith.addf %140, %142 : vector<4x128xf32>
    %cst_133 = arith.constant 0.000000e+00 : f32
    %144 = vector.broadcast %cst_133 : f32 to vector<4x128xf32>
    %145 = arith.maximumf %143, %144 : vector<4x128xf32>
    %146 = arith.truncf %145 : vector<4x128xf32> to vector<4x128xbf16>
    %c0_134 = arith.constant 0 : index
    %c0_135 = arith.constant 0 : index
    %c0_136 = arith.constant 0 : index
    %147 = vector.load %arg17[%c0_134, %c0_135, %c0_136] : memref<3x2x4xbf16, #tpu.memory_space<vmem>>, vector<1x2x4xbf16>
    %148 = vector.shape_cast %147 : vector<1x2x4xbf16> to vector<2x4xbf16>
    %cst_137 = arith.constant dense<0.000000e+00> : vector<2x128xf32>
    %149 = tpu.matmul %148, %146, %cst_137 {dimension_numbers = #tpu.dot_dimension_numbers<[1], [0], [0], [1], [0, 0, 1, 1], [], []>} : vector<2x4xbf16>, vector<4x128xbf16>, vector<2x128xf32> -> vector<2x128xf32>
    %150 = arith.truncf %149 : vector<2x128xf32> to vector<2x128xbf16>
    %c0_138 = arith.constant 0 : index
    %c0_139 = arith.constant 0 : index
    %c0_140 = arith.constant 0 : index
    %151 = vector.load %arg18[%c0_138, %c0_139, %c0_140] : memref<3x128x128xbf16, #tpu.memory_space<vmem>>, vector<1x128x128xbf16>
    %152 = vector.shape_cast %151 : vector<1x128x128xbf16> to vector<128x128xbf16>
    %cst_141 = arith.constant dense<0.000000e+00> : vector<2x128xf32>
    %153 = tpu.matmul %150, %152, %cst_141 {dimension_numbers = #tpu.dot_dimension_numbers<[1], [0], [0], [1], [0, 0, 1, 1], [], []>} : vector<2x128xbf16>, vector<128x128xbf16>, vector<2x128xf32> -> vector<2x128xf32>
    %c1_142 = arith.constant 1 : index
    %c0_143 = arith.constant 0 : index
    %c0_144 = arith.constant 0 : index
    %154 = vector.load %arg17[%c1_142, %c0_143, %c0_144] : memref<3x2x4xbf16, #tpu.memory_space<vmem>>, vector<1x2x4xbf16>
    %155 = vector.shape_cast %154 : vector<1x2x4xbf16> to vector<2x4xbf16>
    %cst_145 = arith.constant dense<0.000000e+00> : vector<2x128xf32>
    %156 = tpu.matmul %155, %146, %cst_145 {dimension_numbers = #tpu.dot_dimension_numbers<[1], [0], [0], [1], [0, 0, 1, 1], [], []>} : vector<2x4xbf16>, vector<4x128xbf16>, vector<2x128xf32> -> vector<2x128xf32>
    %157 = arith.truncf %156 : vector<2x128xf32> to vector<2x128xbf16>
    %c1_146 = arith.constant 1 : index
    %c0_147 = arith.constant 0 : index
    %c0_148 = arith.constant 0 : index
    %158 = vector.load %arg18[%c1_146, %c0_147, %c0_148] : memref<3x128x128xbf16, #tpu.memory_space<vmem>>, vector<1x128x128xbf16>
    %159 = vector.shape_cast %158 : vector<1x128x128xbf16> to vector<128x128xbf16>
    %cst_149 = arith.constant dense<0.000000e+00> : vector<2x128xf32>
    %160 = tpu.matmul %157, %159, %cst_149 {dimension_numbers = #tpu.dot_dimension_numbers<[1], [0], [0], [1], [0, 0, 1, 1], [], []>} : vector<2x128xbf16>, vector<128x128xbf16>, vector<2x128xf32> -> vector<2x128xf32>
    %161 = arith.addf %153, %160 : vector<2x128xf32>
    %c2_150 = arith.constant 2 : index
    %c0_151 = arith.constant 0 : index
    %c0_152 = arith.constant 0 : index
    %162 = vector.load %arg17[%c2_150, %c0_151, %c0_152] : memref<3x2x4xbf16, #tpu.memory_space<vmem>>, vector<1x2x4xbf16>
    %163 = vector.shape_cast %162 : vector<1x2x4xbf16> to vector<2x4xbf16>
    %cst_153 = arith.constant dense<0.000000e+00> : vector<2x128xf32>
    %164 = tpu.matmul %163, %146, %cst_153 {dimension_numbers = #tpu.dot_dimension_numbers<[1], [0], [0], [1], [0, 0, 1, 1], [], []>} : vector<2x4xbf16>, vector<4x128xbf16>, vector<2x128xf32> -> vector<2x128xf32>
    %165 = arith.truncf %164 : vector<2x128xf32> to vector<2x128xbf16>
    %c2_154 = arith.constant 2 : index
    %c0_155 = arith.constant 0 : index
    %c0_156 = arith.constant 0 : index
    %166 = vector.load %arg18[%c2_154, %c0_155, %c0_156] : memref<3x128x128xbf16, #tpu.memory_space<vmem>>, vector<1x128x128xbf16>
    %167 = vector.shape_cast %166 : vector<1x128x128xbf16> to vector<128x128xbf16>
    %cst_157 = arith.constant dense<0.000000e+00> : vector<2x128xf32>
    %168 = tpu.matmul %165, %167, %cst_157 {dimension_numbers = #tpu.dot_dimension_numbers<[1], [0], [0], [1], [0, 0, 1, 1], [], []>} : vector<2x128xbf16>, vector<128x128xbf16>, vector<2x128xf32> -> vector<2x128xf32>
    %169 = arith.addf %161, %168 : vector<2x128xf32>
    %c0_158 = arith.constant 0 : index
    %c0_159 = arith.constant 0 : index
    %170 = vector.load %arg19[%c0_158, %c0_159] : memref<1x128xf32, #tpu.memory_space<vmem>>, vector<1x128xf32>
    %171 = vector.broadcast %170 : vector<1x128xf32> to vector<2x128xf32>
    %172 = arith.addf %169, %171 : vector<2x128xf32>
    %cst_160 = arith.constant 0.000000e+00 : f32
    %173 = vector.broadcast %cst_160 : f32 to vector<2x128xf32>
    %174 = arith.maximumf %172, %173 : vector<2x128xf32>
    %175 = arith.truncf %174 : vector<2x128xf32> to vector<2x128xbf16>
    %c0_161 = arith.constant 0 : index
    %c0_162 = arith.constant 0 : index
    %c0_163 = arith.constant 0 : index
    %176 = vector.load %arg20[%c0_161, %c0_162, %c0_163] : memref<1x2x128xbf16, #tpu.memory_space<vmem>>, vector<1x2x128xbf16>
    %177 = vector.shape_cast %176 : vector<1x2x128xbf16> to vector<2x128xbf16>
    %178 = vector.shape_cast %175 : vector<2x128xbf16> to vector<1x2x128xbf16>
    tpu.vector_store %arg20[%c0_161, %c0_162, %c0_163], %178 {strides = array<i32>} : memref<1x2x128xbf16, #tpu.memory_space<vmem>>, vector<1x2x128xbf16>,
    return
  }
  func.func @transform_0(%arg0: i32) -> (i32, i32, i32) {
    %c0_i32 = arith.constant 0 : i32
    %c0_i32_0 = arith.constant 0 : i32
    %c0_i32_1 = arith.constant 0 : i32
    return %arg0, %c0_i32, %c0_i32_0 : i32, i32, i32
  }
  func.func @transform_1(%arg0: i32) -> (i32, i32, i32) {
    %c0_i32 = arith.constant 0 : i32
    %c0_i32_0 = arith.constant 0 : i32
    %c0_i32_1 = arith.constant 0 : i32
    %c0_i32_2 = arith.constant 0 : i32
    return %c0_i32, %c0_i32_0, %c0_i32_1 : i32, i32, i32
  }
  func.func @transform_2(%arg0: i32) -> (i32, i32, i32) {
    %c0_i32 = arith.constant 0 : i32
    %c0_i32_0 = arith.constant 0 : i32
    %c0_i32_1 = arith.constant 0 : i32
    %c0_i32_2 = arith.constant 0 : i32
    return %c0_i32, %c0_i32_0, %c0_i32_1 : i32, i32, i32
  }
  func.func @transform_3(%arg0: i32) -> (i32, i32) {
    %c0_i32 = arith.constant 0 : i32
    %c0_i32_0 = arith.constant 0 : i32
    %c0_i32_1 = arith.constant 0 : i32
    return %c0_i32, %c0_i32_0 : i32, i32
  }
  func.func @transform_4(%arg0: i32) -> (i32, i32, i32) {
    %c0_i32 = arith.constant 0 : i32
    %c0_i32_0 = arith.constant 0 : i32
    %c0_i32_1 = arith.constant 0 : i32
    %c0_i32_2 = arith.constant 0 : i32
    return %c0_i32, %c0_i32_0, %c0_i32_1 : i32, i32, i32
  }
  func.func @transform_5(%arg0: i32) -> (i32, i32, i32) {
    %c0_i32 = arith.constant 0 : i32
    %c0_i32_0 = arith.constant 0 : i32
    %c0_i32_1 = arith.constant 0 : i32
    %c0_i32_2 = arith.constant 0 : i32
    return %c0_i32, %c0_i32_0, %c0_i32_1 : i32, i32, i32
  }
  func.func @transform_6(%arg0: i32) -> (i32, i32) {
    %c0_i32 = arith.constant 0 : i32
    %c0_i32_0 = arith.constant 0 : i32
    %c0_i32_1 = arith.constant 0 : i32
    return %c0_i32, %c0_i32_0 : i32, i32
  }
  func.func @transform_7(%arg0: i32) -> (i32, i32, i32) {
    %c0_i32 = arith.constant 0 : i32
    %c0_i32_0 = arith.constant 0 : i32
    %c0_i32_1 = arith.constant 0 : i32
    %c0_i32_2 = arith.constant 0 : i32
    return %c0_i32, %c0_i32_0, %c0_i32_1 : i32, i32, i32
  }
  func.func @transform_8(%arg0: i32) -> (i32, i32, i32) {
    %c0_i32 = arith.constant 0 : i32
    %c0_i32_0 = arith.constant 0 : i32
    %c0_i32_1 = arith.constant 0 : i32
    %c0_i32_2 = arith.constant 0 : i32
    return %c0_i32, %c0_i32_0, %c0_i32_1 : i32, i32, i32
  }
  func.func @transform_9(%arg0: i32) -> (i32, i32) {
    %c0_i32 = arith.constant 0 : i32
    %c0_i32_0 = arith.constant 0 : i32
    %c0_i32_1 = arith.constant 0 : i32
    return %c0_i32, %c0_i32_0 : i32, i32
  }
  func.func @transform_10(%arg0: i32) -> (i32, i32, i32) {
    %c0_i32 = arith.constant 0 : i32
    %c0_i32_0 = arith.constant 0 : i32
    %c0_i32_1 = arith.constant 0 : i32
    %c0_i32_2 = arith.constant 0 : i32
    return %c0_i32, %c0_i32_0, %c0_i32_1 : i32, i32, i32
  }
  func.func @transform_11(%arg0: i32) -> (i32, i32, i32) {
    %c0_i32 = arith.constant 0 : i32
    %c0_i32_0 = arith.constant 0 : i32
    %c0_i32_1 = arith.constant 0 : i32
    %c0_i32_2 = arith.constant 0 : i32
    return %c0_i32, %c0_i32_0, %c0_i32_1 : i32, i32, i32
  }
  func.func @transform_12(%arg0: i32) -> (i32, i32) {
    %c0_i32 = arith.constant 0 : i32
    %c0_i32_0 = arith.constant 0 : i32
    %c0_i32_1 = arith.constant 0 : i32
    return %c0_i32, %c0_i32_0 : i32, i32
  }
  func.func @transform_13(%arg0: i32) -> (i32, i32, i32) {
    %c0_i32 = arith.constant 0 : i32
    %c0_i32_0 = arith.constant 0 : i32
    %c0_i32_1 = arith.constant 0 : i32
    %c0_i32_2 = arith.constant 0 : i32
    return %c0_i32, %c0_i32_0, %c0_i32_1 : i32, i32, i32
  }
  func.func @transform_14(%arg0: i32) -> (i32, i32, i32) {
    %c0_i32 = arith.constant 0 : i32
    %c0_i32_0 = arith.constant 0 : i32
    %c0_i32_1 = arith.constant 0 : i32
    %c0_i32_2 = arith.constant 0 : i32
    return %c0_i32, %c0_i32_0, %c0_i32_1 : i32, i32, i32
  }
  func.func @transform_15(%arg0: i32) -> (i32, i32) {
    %c0_i32 = arith.constant 0 : i32
    %c0_i32_0 = arith.constant 0 : i32
    %c0_i32_1 = arith.constant 0 : i32
    return %c0_i32, %c0_i32_0 : i32, i32
  }
  func.func @transform_16(%arg0: i32) -> (i32, i32, i32) {
    %c0_i32 = arith.constant 0 : i32
    %c0_i32_0 = arith.constant 0 : i32
    %c0_i32_1 = arith.constant 0 : i32
    %c0_i32_2 = arith.constant 0 : i32
    return %c0_i32, %c0_i32_0, %c0_i32_1 : i32, i32, i32
  }
  func.func @transform_17(%arg0: i32) -> (i32, i32, i32) {
    %c0_i32 = arith.constant 0 : i32
    %c0_i32_0 = arith.constant 0 : i32
    %c0_i32_1 = arith.constant 0 : i32
    %c0_i32_2 = arith.constant 0 : i32
    return %c0_i32, %c0_i32_0, %c0_i32_1 : i32, i32, i32
  }
  func.func @transform_18(%arg0: i32) -> (i32, i32) {
    %c0_i32 = arith.constant 0 : i32
    %c0_i32_0 = arith.constant 0 : i32
    %c0_i32_1 = arith.constant 0 : i32
    return %c0_i32, %c0_i32_0 : i32, i32
  }
  func.func @transform_19(%arg0: i32) -> (i32, i32, i32) {
    %c0_i32 = arith.constant 0 : i32
    %c0_i32_0 = arith.constant 0 : i32
    %c0_i32_1 = arith.constant 0 : i32
    return %arg0, %c0_i32, %c0_i32_0 : i32, i32, i32
  }
}

module attributes {stable_mosaic.version = 11 : i64} {
  func.func @gru_kernel(%arg0: i32, %arg1: memref<4x128xbf16, #tpu.memory_space<vmem>>, %arg2: memref<128x96xbf16, #tpu.memory_space<vmem>>, %arg3: memref<1x96xf32, #tpu.memory_space<vmem>>, %arg4: memref<32x96xbf16, #tpu.memory_space<vmem>>, %arg5: memref<1x96xf32, #tpu.memory_space<vmem>>, %arg6: memref<2x32xf32, #tpu.memory_space<vmem>>, %arg7: memref<4x32xf32, #tpu.memory_space<vmem>>, %arg8: memref<4x32xf32, #tpu.memory_space<vmem>>, %arg9: memref<4x32xf32, #tpu.memory_space<vmem>>) attributes {dimension_semantics = [#tpu.dimension_semantics<arbitrary>], iteration_bounds = array<i64: 1>, scalar_prefetch = 0 : i64, scratch_operands = 3 : i64, tpu.core_type = #tpu.core_type<tc>, window_params = [{pipeline_mode = #tpu.pipeline_mode<synchronous>, transform_indices = @transform_0, window_bounds = array<i64: 4, 128>}, {pipeline_mode = #tpu.pipeline_mode<synchronous>, transform_indices = @transform_1, window_bounds = array<i64: 128, 96>}, {pipeline_mode = #tpu.pipeline_mode<synchronous>, transform_indices = @transform_2, window_bounds = array<i64: 1, 96>}, {pipeline_mode = #tpu.pipeline_mode<synchronous>, transform_indices = @transform_3, window_bounds = array<i64: 32, 96>}, {pipeline_mode = #tpu.pipeline_mode<synchronous>, transform_indices = @transform_4, window_bounds = array<i64: 1, 96>}, {pipeline_mode = #tpu.pipeline_mode<synchronous>, transform_indices = @transform_5, window_bounds = array<i64: 2, 32>}]} {
    %c0 = arith.constant 0 : index
    %c0_0 = arith.constant 0 : index
    %0 = vector.load %arg1[%c0, %c0_0] : memref<4x128xbf16, #tpu.memory_space<vmem>>, vector<4x128xbf16>
    %c0_1 = arith.constant 0 : index
    %c0_2 = arith.constant 0 : index
    %1 = vector.load %arg2[%c0_1, %c0_2] : memref<128x96xbf16, #tpu.memory_space<vmem>>, vector<128x96xbf16>
    %cst = arith.constant dense<0.000000e+00> : vector<4x96xf32>
    %2 = tpu.matmul %0, %1, %cst {dimension_numbers = #tpu.dot_dimension_numbers<[1], [0], [0], [1], [0, 0, 1, 1], [], []>} : vector<4x128xbf16>, vector<128x96xbf16>, vector<4x96xf32> -> vector<4x96xf32>
    %c0_3 = arith.constant 0 : index
    %c0_4 = arith.constant 0 : index
    %3 = vector.load %arg3[%c0_3, %c0_4] : memref<1x96xf32, #tpu.memory_space<vmem>>, vector<1x96xf32>
    %4 = vector.broadcast %3 : vector<1x96xf32> to vector<4x96xf32>
    %5 = arith.addf %2, %4 : vector<4x96xf32>
    %6 = vector.extract_strided_slice %5 {offsets = [0, 0], sizes = [4, 32], strides = [1, 1]} : vector<4x96xf32> to vector<4x32xf32>
    %c0_5 = arith.constant 0 : index
    %c0_6 = arith.constant 0 : index
    %7 = vector.load %arg7[%c0_5, %c0_6] : memref<4x32xf32, #tpu.memory_space<vmem>>, vector<4x32xf32>
    tpu.vector_store %arg7[%c0_5, %c0_6], %6 {strides = array<i32>} : memref<4x32xf32, #tpu.memory_space<vmem>>, vector<4x32xf32>,
    %8 = vector.extract_strided_slice %5 {offsets = [0, 32], sizes = [4, 32], strides = [1, 1]} : vector<4x96xf32> to vector<4x32xf32>
    %c0_7 = arith.constant 0 : index
    %c0_8 = arith.constant 0 : index
    %9 = vector.load %arg8[%c0_7, %c0_8] : memref<4x32xf32, #tpu.memory_space<vmem>>, vector<4x32xf32>
    tpu.vector_store %arg8[%c0_7, %c0_8], %8 {strides = array<i32>} : memref<4x32xf32, #tpu.memory_space<vmem>>, vector<4x32xf32>,
    %10 = vector.extract_strided_slice %5 {offsets = [0, 64], sizes = [4, 32], strides = [1, 1]} : vector<4x96xf32> to vector<4x32xf32>
    %c0_9 = arith.constant 0 : index
    %c0_10 = arith.constant 0 : index
    %11 = vector.load %arg9[%c0_9, %c0_10] : memref<4x32xf32, #tpu.memory_space<vmem>>, vector<4x32xf32>
    tpu.vector_store %arg9[%c0_9, %c0_10], %10 {strides = array<i32>} : memref<4x32xf32, #tpu.memory_space<vmem>>, vector<4x32xf32>,
    %c0_11 = arith.constant 0 : index
    %c0_12 = arith.constant 0 : index
    %12 = vector.load %arg5[%c0_11, %c0_12] : memref<1x96xf32, #tpu.memory_space<vmem>>, vector<1x32xf32>
    %c0_13 = arith.constant 0 : index
    %c32 = arith.constant 32 : index
    %13 = vector.load %arg5[%c0_13, %c32] : memref<1x96xf32, #tpu.memory_space<vmem>>, vector<1x32xf32>
    %c0_14 = arith.constant 0 : index
    %c64 = arith.constant 64 : index
    %14 = vector.load %arg5[%c0_14, %c64] : memref<1x96xf32, #tpu.memory_space<vmem>>, vector<1x32xf32>
    %c0_15 = arith.constant 0 : index
    %c0_16 = arith.constant 0 : index
    %15 = vector.load %arg4[%c0_15, %c0_16] : memref<32x96xbf16, #tpu.memory_space<vmem>>, vector<32x32xbf16>
    %c0_17 = arith.constant 0 : index
    %c32_18 = arith.constant 32 : index
    %16 = vector.load %arg4[%c0_17, %c32_18] : memref<32x96xbf16, #tpu.memory_space<vmem>>, vector<32x32xbf16>
    %c0_19 = arith.constant 0 : index
    %c64_20 = arith.constant 64 : index
    %17 = vector.load %arg4[%c0_19, %c64_20] : memref<32x96xbf16, #tpu.memory_space<vmem>>, vector<32x32xbf16>
    %cst_21 = arith.constant 0.000000e+00 : f32
    %18 = vector.broadcast %cst_21 : f32 to vector<2x32xf32>
    %c0_i32 = arith.constant 0 : i32
    %19 = arith.truncf %18 : vector<2x32xf32> to vector<2x32xbf16>
    %c2_i32 = arith.constant 2 : i32
    %20 = arith.muli %c0_i32, %c2_i32 : i32
    %21 = arith.index_cast %20 : i32 to index
    %c0_22 = arith.constant 0 : index
    %22 = vector.load %arg7[%21, %c0_22] : memref<4x32xf32, #tpu.memory_space<vmem>>, vector<2x32xf32>
    %c2_i32_23 = arith.constant 2 : i32
    %23 = arith.muli %c0_i32, %c2_i32_23 : i32
    %24 = arith.index_cast %23 : i32 to index
    %c0_24 = arith.constant 0 : index
    %25 = vector.load %arg8[%24, %c0_24] : memref<4x32xf32, #tpu.memory_space<vmem>>, vector<2x32xf32>
    %c2_i32_25 = arith.constant 2 : i32
    %26 = arith.muli %c0_i32, %c2_i32_25 : i32
    %27 = arith.index_cast %26 : i32 to index
    %c0_26 = arith.constant 0 : index
    %28 = vector.load %arg9[%27, %c0_26] : memref<4x32xf32, #tpu.memory_space<vmem>>, vector<2x32xf32>
    %cst_27 = arith.constant dense<0.000000e+00> : vector<2x32xf32>
    %29 = tpu.matmul %19, %15, %cst_27 {dimension_numbers = #tpu.dot_dimension_numbers<[1], [0], [0], [1], [0, 0, 1, 1], [], []>} : vector<2x32xbf16>, vector<32x32xbf16>, vector<2x32xf32> -> vector<2x32xf32>
    %cst_28 = arith.constant dense<0.000000e+00> : vector<2x32xf32>
    %30 = tpu.matmul %19, %16, %cst_28 {dimension_numbers = #tpu.dot_dimension_numbers<[1], [0], [0], [1], [0, 0, 1, 1], [], []>} : vector<2x32xbf16>, vector<32x32xbf16>, vector<2x32xf32> -> vector<2x32xf32>
    %cst_29 = arith.constant dense<0.000000e+00> : vector<2x32xf32>
    %31 = tpu.matmul %19, %17, %cst_29 {dimension_numbers = #tpu.dot_dimension_numbers<[1], [0], [0], [1], [0, 0, 1, 1], [], []>} : vector<2x32xbf16>, vector<32x32xbf16>, vector<2x32xf32> -> vector<2x32xf32>
    %32 = arith.addf %22, %29 : vector<2x32xf32>
    %33 = vector.broadcast %12 : vector<1x32xf32> to vector<2x32xf32>
    %34 = arith.addf %32, %33 : vector<2x32xf32>
    %35 = arith.negf %34 : vector<2x32xf32>
    %36 = math.exp %35 : vector<2x32xf32>
    %cst_30 = arith.constant 1.000000e+00 : f32
    %37 = vector.broadcast %cst_30 : f32 to vector<2x32xf32>
    %38 = arith.addf %37, %36 : vector<2x32xf32>
    %39 = arith.divf %37, %38 : vector<2x32xf32>
    %40 = arith.addf %25, %30 : vector<2x32xf32>
    %41 = vector.broadcast %13 : vector<1x32xf32> to vector<2x32xf32>
    %42 = arith.addf %40, %41 : vector<2x32xf32>
    %43 = arith.negf %42 : vector<2x32xf32>
    %44 = math.exp %43 : vector<2x32xf32>
    %cst_31 = arith.constant 1.000000e+00 : f32
    %45 = vector.broadcast %cst_31 : f32 to vector<2x32xf32>
    %46 = arith.addf %45, %44 : vector<2x32xf32>
    %47 = arith.divf %45, %46 : vector<2x32xf32>
    %48 = vector.broadcast %14 : vector<1x32xf32> to vector<2x32xf32>
    %49 = arith.addf %31, %48 : vector<2x32xf32>
    %50 = arith.mulf %39, %49 : vector<2x32xf32>
    %51 = arith.addf %28, %50 : vector<2x32xf32>
    %52 = math.tanh %51 : vector<2x32xf32>
    %cst_32 = arith.constant 1.000000e+00 : f32
    %53 = vector.broadcast %cst_32 : f32 to vector<2x32xf32>
    %54 = arith.subf %53, %47 : vector<2x32xf32>
    %55 = arith.mulf %54, %52 : vector<2x32xf32>
    %56 = arith.mulf %47, %18 : vector<2x32xf32>
    %57 = arith.addf %55, %56 : vector<2x32xf32>
    %c1_i32 = arith.constant 1 : i32
    %58 = arith.truncf %57 : vector<2x32xf32> to vector<2x32xbf16>
    %c2_i32_33 = arith.constant 2 : i32
    %59 = arith.muli %c1_i32, %c2_i32_33 : i32
    %60 = arith.index_cast %59 : i32 to index
    %c0_34 = arith.constant 0 : index
    %61 = vector.load %arg7[%60, %c0_34] : memref<4x32xf32, #tpu.memory_space<vmem>>, vector<2x32xf32>
    %c2_i32_35 = arith.constant 2 : i32
    %62 = arith.muli %c1_i32, %c2_i32_35 : i32
    %63 = arith.index_cast %62 : i32 to index
    %c0_36 = arith.constant 0 : index
    %64 = vector.load %arg8[%63, %c0_36] : memref<4x32xf32, #tpu.memory_space<vmem>>, vector<2x32xf32>
    %c2_i32_37 = arith.constant 2 : i32
    %65 = arith.muli %c1_i32, %c2_i32_37 : i32
    %66 = arith.index_cast %65 : i32 to index
    %c0_38 = arith.constant 0 : index
    %67 = vector.load %arg9[%66, %c0_38] : memref<4x32xf32, #tpu.memory_space<vmem>>, vector<2x32xf32>
    %cst_39 = arith.constant dense<0.000000e+00> : vector<2x32xf32>
    %68 = tpu.matmul %58, %15, %cst_39 {dimension_numbers = #tpu.dot_dimension_numbers<[1], [0], [0], [1], [0, 0, 1, 1], [], []>} : vector<2x32xbf16>, vector<32x32xbf16>, vector<2x32xf32> -> vector<2x32xf32>
    %cst_40 = arith.constant dense<0.000000e+00> : vector<2x32xf32>
    %69 = tpu.matmul %58, %16, %cst_40 {dimension_numbers = #tpu.dot_dimension_numbers<[1], [0], [0], [1], [0, 0, 1, 1], [], []>} : vector<2x32xbf16>, vector<32x32xbf16>, vector<2x32xf32> -> vector<2x32xf32>
    %cst_41 = arith.constant dense<0.000000e+00> : vector<2x32xf32>
    %70 = tpu.matmul %58, %17, %cst_41 {dimension_numbers = #tpu.dot_dimension_numbers<[1], [0], [0], [1], [0, 0, 1, 1], [], []>} : vector<2x32xbf16>, vector<32x32xbf16>, vector<2x32xf32> -> vector<2x32xf32>
    %71 = arith.addf %61, %68 : vector<2x32xf32>
    %72 = vector.broadcast %12 : vector<1x32xf32> to vector<2x32xf32>
    %73 = arith.addf %71, %72 : vector<2x32xf32>
    %74 = arith.negf %73 : vector<2x32xf32>
    %75 = math.exp %74 : vector<2x32xf32>
    %cst_42 = arith.constant 1.000000e+00 : f32
    %76 = vector.broadcast %cst_42 : f32 to vector<2x32xf32>
    %77 = arith.addf %76, %75 : vector<2x32xf32>
    %78 = arith.divf %76, %77 : vector<2x32xf32>
    %79 = arith.addf %64, %69 : vector<2x32xf32>
    %80 = vector.broadcast %13 : vector<1x32xf32> to vector<2x32xf32>
    %81 = arith.addf %79, %80 : vector<2x32xf32>
    %82 = arith.negf %81 : vector<2x32xf32>
    %83 = math.exp %82 : vector<2x32xf32>
    %cst_43 = arith.constant 1.000000e+00 : f32
    %84 = vector.broadcast %cst_43 : f32 to vector<2x32xf32>
    %85 = arith.addf %84, %83 : vector<2x32xf32>
    %86 = arith.divf %84, %85 : vector<2x32xf32>
    %87 = vector.broadcast %14 : vector<1x32xf32> to vector<2x32xf32>
    %88 = arith.addf %70, %87 : vector<2x32xf32>
    %89 = arith.mulf %78, %88 : vector<2x32xf32>
    %90 = arith.addf %67, %89 : vector<2x32xf32>
    %91 = math.tanh %90 : vector<2x32xf32>
    %cst_44 = arith.constant 1.000000e+00 : f32
    %92 = vector.broadcast %cst_44 : f32 to vector<2x32xf32>
    %93 = arith.subf %92, %86 : vector<2x32xf32>
    %94 = arith.mulf %93, %91 : vector<2x32xf32>
    %95 = arith.mulf %86, %57 : vector<2x32xf32>
    %96 = arith.addf %94, %95 : vector<2x32xf32>
    %c2_i32_45 = arith.constant 2 : i32
    %c0_46 = arith.constant 0 : index
    %c0_47 = arith.constant 0 : index
    %97 = vector.load %arg6[%c0_46, %c0_47] : memref<2x32xf32, #tpu.memory_space<vmem>>, vector<2x32xf32>
    tpu.vector_store %arg6[%c0_46, %c0_47], %96 {strides = array<i32>} : memref<2x32xf32, #tpu.memory_space<vmem>>, vector<2x32xf32>,
    return
  }
  func.func @transform_0(%arg0: i32) -> (i32, i32) {
    %c0_i32 = arith.constant 0 : i32
    %c0_i32_0 = arith.constant 0 : i32
    %c0_i32_1 = arith.constant 0 : i32
    return %c0_i32, %c0_i32_0 : i32, i32
  }
  func.func @transform_1(%arg0: i32) -> (i32, i32) {
    %c0_i32 = arith.constant 0 : i32
    %c0_i32_0 = arith.constant 0 : i32
    %c0_i32_1 = arith.constant 0 : i32
    return %c0_i32, %c0_i32_0 : i32, i32
  }
  func.func @transform_2(%arg0: i32) -> (i32, i32) {
    %c0_i32 = arith.constant 0 : i32
    %c0_i32_0 = arith.constant 0 : i32
    %c0_i32_1 = arith.constant 0 : i32
    return %c0_i32, %c0_i32_0 : i32, i32
  }
  func.func @transform_3(%arg0: i32) -> (i32, i32) {
    %c0_i32 = arith.constant 0 : i32
    %c0_i32_0 = arith.constant 0 : i32
    %c0_i32_1 = arith.constant 0 : i32
    return %c0_i32, %c0_i32_0 : i32, i32
  }
  func.func @transform_4(%arg0: i32) -> (i32, i32) {
    %c0_i32 = arith.constant 0 : i32
    %c0_i32_0 = arith.constant 0 : i32
    %c0_i32_1 = arith.constant 0 : i32
    return %c0_i32, %c0_i32_0 : i32, i32
  }
  func.func @transform_5(%arg0: i32) -> (i32, i32) {
    %c0_i32 = arith.constant 0 : i32
    %c0_i32_0 = arith.constant 0 : i32
    %c0_i32_1 = arith.constant 0 : i32
    return %c0_i32, %c0_i32_0 : i32, i32
  }
}

</mosaic_0001>

<bundles_post_ra>
// kernel: reference_encoder_forward.3
= control target key start
LH: loop header
LB: loop body
LE: loop exit
PB: predicated region body
PF: predicated region fallthrough
CT: control target
= control target key end

     0   :  { %s470_s22 = smov 64   ;;  %s471_s23 = smov 96   ;;  %s576_s0 = inlined_call_operand.vmem [shape: bf16[4,128], index: 0, kind: input, shape index: {}]   ;;  %s577_s1 = inlined_call_operand.vmem [shape: bf16[128,96], index: 1, kind: input, shape index: {}]   ;;  %s578_s2 = inlined_call_operand.vmem [shape: f32[1,96], index: 2, kind: input, shape index: {}]   ;;  %s579_s3 = inlined_call_operand.vmem [shape: bf16[32,96], index: 3, kind: input, shape index: {}]   ;;  %s580_s4 = inlined_call_operand.vmem [shape: f32[1,96], index: 4, kind: input, shape index: {}]   ;;  %s581_s5 = inlined_call_operand.hbm [shape: f32[2,32], index: 5, kind: output, shape index: {}]  }
   0x1   :  { %v417_v0 = vld [vmem:[%s579_s3 + $0x8] sm:$0xff]  ;;  %v415_v1 = vld [vmem:[%s577_s1 + $0x38] sm:$0xff]  ;;  %v414_v2 = vld [vmem:[%s577_s1 + $0x30] sm:$0xff] }
   0x2   :  { %221 = vrot.lane.b32.xlu1 %v417_v0, %s470_s22  ;;  %154 = vrot.lane.b32.xlu0 %v417_v0, %s471_s23 }
   0x3   :  { %91 = vmatpush.bf16.msra.mxu0 %v415_v1  ;;  %145 = vmatpush.bf16.msra.mxu1 %v417_v0 }
   0x4   :  { %10 = vsyncpa [#allocation6], 0  ;;  %v416_v3 = vld [vmem:[%s579_s3] sm:$0xff]  ;;  %v413_v4 = vld [vmem:[%s577_s1 + $0x28] sm:$0xff]  ;;  %v472_v6 = vmov 0   ;;  %vm104_vm0 = vcmask 257024  }
   0x5   :  { %v412_v5 = vld [vmem:[%s577_s1 + $0x20] sm:$0xff]  ;;  %v411_v7 = vld [vmem:[%s577_s1 + $0x18] sm:$0xff]  ;;  %v410_v8 = vld [vmem:[%s577_s1 + $0x10] sm:$0xff]  ;;  %vm135_vm9 = vcmask 261120   ;;  %s352_s20 = sshll.u32 %s581_s5, 4  ;;  %s353_s20 = int_to_ptr.hbm [resolvable:$true] %s352_s20 }
   0x6   :  { %v409_v9 = vld [vmem:[%s577_s1 + $0x8] sm:$0xff]  ;;  %v408_v10 = vld [vmem:[%s577_s1] sm:$0xff] }
   0x7   :  { %92 = vmatpush.bf16.msra.mxu0 %v414_v2  ;;  %146 = vmatpush.bf16.msra.mxu1 %v416_v3  ;;  %v22_v11 = vld [vmem:[%s576_s0] sm:$0x3] }
   0x8   :  { %v544_v12 = vld [vmem:[%s580_s4] ss:$0 sm:$0xff] }
   0x9   :  { %v423_v19 = vld [vmem:[%s578_s2] ss:$0 sm:$0xff]  ;;  %s473_s2 = smov [#allocation5]  }
   0xa   :  { %219 = vrot.lane.b32.xlu1 %v416_v3, %s470_s22  ;;  %152 = vrot.lane.b32.xlu0 %v416_v3, %s471_s23  ;;  %s350_s4 = sshll.u32 %s473_s2, 4  ;;  %s351_s4 = int_to_ptr.vmem [resolvable:$true] %s350_s4 }
   0xb   :  { %261 = vmatpush.bf16.msrb.mxu1 %v417_v0  ;;  %93 = vmatpush.bf16.msra.mxu0 %v413_v4 }
   0xc   :  { %147 = vmatmul.bf16.vlgmr.msra.gmra.mxu1 %v472_v6 }
   0xf   :  { %262 = vmatpush.bf16.msrb.mxu1 %v416_v3  ;;  %94 = vmatpush.bf16.msra.mxu0 %v412_v5 }
  0x12   :  { %225 = vrot.lane.b32.xlu1 %v544_v12, %s470_s22 }
  0x13   :  { %95 = vmatpush.bf16.msra.mxu0 %v411_v7 }
  0x17   :  { %96 = vmatpush.bf16.msra.mxu0 %v410_v8 }
  0x1b   :  { %97 = vmatpush.bf16.msra.mxu0 %v409_v9 }
  0x1f   :  { %98 = vmatpush.bf16.msra.mxu0 %v408_v10 }
  0x22   :  { %99 = vmatmul.bf16.vlgmr.msra.gmra.mxu0 %v22_v11 }
  0x74   :  { %v222_v13 = vpop.permute.xlu1 %221  ;;  %v155_v14 = vpop.permute.xlu0 %154 }
  0x75   :  { %164 = vmatpush.bf16.msra.mxu2 %v155_v14  ;;  %234 = vmatpush.bf16.msra.mxu3 %v222_v13 }
  0x7c   :  { %v220_v15 = vpop.permute.xlu1 %219  ;;  %v153_v16 = vpop.permute.xlu0 %152 }
  0x7d   :  { %165 = vmatpush.bf16.msra.mxu2 %v153_v16  ;;  %235 = vmatpush.bf16.msra.mxu3 %v220_v15 }
  0x80   :  { %166 = vmatmul.bf16.vlgmr.msra.gmra.mxu2 %v472_v6  ;;  %236 = vmatmul.bf16.vlgmr.msra.gmra.mxu3 %v472_v6 }
  0x81   :  { %274 = vmatpush.bf16.msrb.mxu2 %v155_v14  ;;  %329 = vmatpush.bf16.msrb.mxu3 %v222_v13 }
  0x84   :  { %v561_v46 = vpop.permute.xlu1 %225 }
  0x85   :  { %275 = vmatpush.bf16.msrb.mxu2 %v153_v16  ;;  %330 = vmatpush.bf16.msrb.mxu3 %v220_v15 }
  0x89   :  { %v148_v17 = vpop.f32.mrf.mxu1 }
  0x91   :  { %v150_v18 = vpop.f32.mrf.mxu1 }
  0x9f   :  { %v100_v20 = vpop.f32.mrf.mxu0 }
  0xa0   :  { %v101_v21 = vadd.f32 %v423_v19, %v100_v20 }
  0xa2   :  { %105 = vst.msk [vmem:[#allocation2] sm:$0xf] %vm104_vm0, %v101_v21  ;;  %111 = vrot.lane.b32.xlu0 %v101_v21, %s470_s22  ;;  %107 = vrot.lane.b32.xlu2 %v101_v21, %s471_s23 }
  0xa7   :  { %v102_v22 = vpop.f32.mrf.mxu0 }
  0xa9   :  { %v120_v23 = vld [vmem:[#allocation2] sm:$0x3]  ;;  %v249_v9 = vld [vmem:[#allocation2 + $0x2] sm:$0x3] }
  0xaa   :  { %196 = vrot.lane.b32.xlu2 %v544_v12, %s471_s23  ;;  %v171_v24 = vadd.f32 %v148_v17, %v120_v23 }
  0xac   :  { %v175_v25 = vadd.f32 %v544_v12, %v171_v24 }
  0xae   :  { %v401_v26 = vmul.f32 -1.442695, %v175_v25 }
  0xb0   :  { %424 = vpow2.f32 %v401_v26 }
  0xb6   :  { %v425_v27 = vpop.eup %424 }
  0xb7   :  { %v179_v28 = vadd.f32 1.0, %v425_v27 }
  0xb9   :  { %426 = vrcp.f32 %v179_v28  ;;  %v191_v47 = vand.u32 2147483648, %v179_v28  ;;  %vm185_vm2 = vweird.f32 %v179_v28  ;;  %v189_v49 = vand.u32 2147483647, %v179_v28 }
  0xbb   :  { %v192_v52 = vor.u32 1.1754944e-38, %v191_v47  ;;  %vm190_vm4 = vcmp.eq.f32.partialorder %v189_v49, 8.507059e+37 }
  0xbf   :  { %v427_v32 = vpop.eup %426 }
  0xc0   :  { %v181_v36 = vmul.f32 %v427_v32, %v179_v28  ;;  %vm186_vm1 = vweird.f32 %v427_v32 }
  0xc1   :  { %vm187_vm3 = vmor %vm185_vm2, %vm186_vm1  ;;  %vm343_vm2 = vcmask 254976  }
  0xc2   :  { %v182_v39 = vsub.f32 1.0, %v181_v36 }
  0xc4   :  { %v183_v42 = vmul.f32 %v427_v32, %v182_v39 }
  0xc6   :  { %v184_v45 = vadd.f32 %v427_v32, %v183_v42 }
  0xc8   :  { %v188_v50 = vsel %vm187_vm3, %v427_v32, %v184_v45 }
  0xc9   :  { %v193_v54 = vsel %vm190_vm4, %v192_v52, %v188_v50 }
  0xfc   :  { %v108_v29 = vpop.permute.xlu2 %107 }
  0xfd   :  { %110 = vst.msk [vmem:[#allocation3] sm:$0xf] %vm104_vm0, %v108_v29 }
 0x103   :  { %v237_v30 = vpop.f32.mrf.mxu3  ;;  %v167_v31 = vpop.f32.mrf.mxu2 }
 0x104   :  { %v121_v33 = vld [vmem:[#allocation3] sm:$0x3]  ;;  %v558_v34 = vpop.permute.xlu2 %196  ;;  %v238_v51 = vadd.f32 %v237_v30, %v561_v46  ;;  %v250_v15 = vld [vmem:[#allocation3 + $0x2] sm:$0x3] }
 0x105   :  { %v195_v35 = vadd.f32 %v167_v31, %v121_v33 }
 0x106   :  { %v241_v55 = vmul.f32 %v238_v51, %v193_v54 }
 0x107   :  { %v199_v37 = vadd.f32 %v558_v34, %v195_v35 }
 0x109   :  { %v402_v38 = vmul.f32 -1.442695, %v199_v37 }
 0x10b   :  { %428 = vpow2.f32 %v402_v38  ;;  %v169_v40 = vpop.f32.mrf.mxu2  ;;  %v239_v41 = vpop.f32.mrf.mxu3 }
 0x111   :  { %v429_v43 = vpop.eup %428 }
 0x112   :  { %v203_v44 = vadd.f32 1.0, %v429_v43 }
 0x114   :  { %430 = vrcp.f32 %v203_v44  ;;  %v112_v48 = vpop.permute.xlu0 %111  ;;  %v215_v60 = vand.u32 2147483648, %v203_v44  ;;  %v213_v62 = vand.u32 2147483647, %v203_v44  ;;  %vm209_vm6 = vweird.f32 %v203_v44 }
 0x115   :  { %114 = vst.msk [vmem:[#allocation4] sm:$0xf] %vm104_vm0, %v112_v48 }
 0x116   :  { %v216_v0 = vor.u32 1.1754944e-38, %v215_v60  ;;  %vm214_vm8 = vcmp.eq.f32.partialorder %v213_v62, 8.507059e+37 }
 0x11a   :  { %v431_v53 = vpop.eup %430 }
 0x11b   :  { %v205_v56 = vmul.f32 %v431_v53, %v203_v44  ;;  %vm210_vm5 = vweird.f32 %v431_v53 }
 0x11c   :  { %v122_v57 = vld [vmem:[#allocation4] sm:$0x3]  ;;  %vm211_vm7 = vmor %vm209_vm6, %vm210_vm5  ;;  %v251_v44 = vld [vmem:[#allocation4 + $0x2] sm:$0x3] }
 0x11d   :  { %v206_v58 = vsub.f32 1.0, %v205_v56  ;;  %v242_v59 = vadd.f32 %v241_v55, %v122_v57 }
 0x11f   :  { %v207_v61 = vmul.f32 %v431_v53, %v206_v58  ;;  %432 = vtanh.f32 %v242_v59 }
 0x121   :  { %v208_v63 = vadd.f32 %v431_v53, %v207_v61 }
 0x123   :  { %v212_v1 = vsel %vm211_vm7, %v431_v53, %v208_v63 }
 0x124   :  { %v217_v2 = vsel %vm214_vm8, %v216_v0, %v212_v1 }
 0x125   :  { %v433_v3 = vpop.eup %432  ;;  %v244_v4 = vsub.f32 1.0, %v217_v2  ;;  %v246_v6 = vmul.f32 0.0, %v217_v2 }
 0x127   :  { %v245_v5 = vmul.f32 %v433_v3, %v244_v4 }
 0x129   :  { %v565_v7 = vadd.f32 %v246_v6, %v245_v5 }
 0x12b   :  { %v248_v8 = vpack.c.bf16 %v565_v7, %v565_v7 }
 0x12d   :  { %403 = vmatmul.msk.bf16.vlgmr.msrb.gmra.mxu1 %vm135_vm9, %v248_v8  ;;  %404 = vmatmul.msk.bf16.vlgmr.msrb.gmra.mxu2 %vm135_vm9, %v248_v8 }
 0x12e   :  { %407 = vmatmul.msk.bf16.vlgmr.msrb.gmra.mxu3 %vm135_vm9, %v248_v8 }
 0x1aa   :  { %v264_v10 = vpop.f32.mrf.mxu1 }
 0x1ab   :  { %v281_v11 = vadd.f32 %v264_v10, %v249_v9 }
 0x1ad   :  { %v282_v13 = vadd.f32 %v544_v12, %v281_v11 }
 0x1af   :  { %v405_v14 = vmul.f32 -1.442695, %v282_v13 }
 0x1b0   :  { %v277_v16 = vpop.f32.mrf.mxu2 }
 0x1b1   :  { %434 = vpow2.f32 %v405_v14  ;;  %v302_v17 = vadd.f32 %v277_v16, %v250_v15  ;;  %v332_v18 = vpop.f32.mrf.mxu3 }
 0x1b2   :  { %v266_v19 = vpop.f32.mrf.mxu1  ;;  %v333_v39 = vadd.f32 %v332_v18, %v561_v46 }
 0x1b3   :  { %v303_v20 = vadd.f32 %v302_v17, %v558_v34 }
 0x1b5   :  { %v406_v21 = vmul.f32 -1.442695, %v303_v20 }
 0x1b7   :  { %v435_v22 = vpop.eup %434  ;;  %436 = vpow2.f32 %v406_v21 }
 0x1b8   :  { %v286_v23 = vadd.f32 1.0, %v435_v22  ;;  %v279_v24 = vpop.f32.mrf.mxu2 }
 0x1b9   :  { %v334_v25 = vpop.f32.mrf.mxu3 }
 0x1ba   :  { %438 = vrcp.f32 %v286_v23  ;;  %v298_v30 = vand.u32 2147483648, %v286_v23  ;;  %v296_v32 = vand.u32 2147483647, %v286_v23  ;;  %vm292_vm11 = vweird.f32 %v286_v23 }
 0x1bc   :  { %v299_v36 = vor.u32 1.1754944e-38, %v298_v30  ;;  %vm297_vm13 = vcmp.eq.f32.partialorder %v296_v32, 8.507059e+37 }
 0x1bd   :  { %v437_v26 = vpop.eup %436 }
 0x1be   :  { %v307_v27 = vadd.f32 1.0, %v437_v26 }
 0x1c0   :  { %v439_v28 = vpop.eup %438  ;;  %440 = vrcp.f32 %v307_v27  ;;  %v319_v43 = vand.u32 2147483648, %v307_v27  ;;  %v317_v45 = vand.u32 2147483647, %v307_v27  ;;  %vm313_vm15 = vweird.f32 %v307_v27 }
 0x1c1   :  { %v288_v12 = vmul.f32 %v439_v28, %v286_v23  ;;  %vm293_vm10 = vweird.f32 %v439_v28 }
 0x1c2   :  { %vm294_vm12 = vmor %vm292_vm11, %vm293_vm10  ;;  %v320_v50 = vor.u32 1.1754944e-38, %v319_v43  ;;  %vm318_vm1 = vcmp.eq.f32.partialorder %v317_v45, 8.507059e+37 }
 0x1c3   :  { %v289_v29 = vsub.f32 1.0, %v288_v12 }
 0x1c5   :  { %v290_v31 = vmul.f32 %v439_v28, %v289_v29 }
 0x1c6   :  { %v441_v33 = vpop.eup %440 }
 0x1c7   :  { %v309_v35 = vmul.f32 %v441_v33, %v307_v27  ;;  %v291_v34 = vadd.f32 %v439_v28, %v290_v31  ;;  %vm314_vm14 = vweird.f32 %v441_v33 }
 0x1c8   :  { %vm315_vm0 = vmor %vm313_vm15, %vm314_vm14 }
 0x1c9   :  { %v310_v37 = vsub.f32 1.0, %v309_v35  ;;  %v295_v38 = vsel %vm294_vm12, %v439_v28, %v291_v34 }
 0x1ca   :  { %v300_v40 = vsel %vm297_vm13, %v299_v36, %v295_v38 }
 0x1cb   :  { %v336_v41 = vmul.f32 %v333_v39, %v300_v40  ;;  %v311_v42 = vmul.f32 %v441_v33, %v310_v37 }
 0x1cd   :  { %v337_v47 = vadd.f32 %v336_v41, %v251_v44  ;;  %v312_v48 = vadd.f32 %v441_v33, %v311_v42 }
 0x1cf   :  { %442 = vtanh.f32 %v337_v47  ;;  %v316_v49 = vsel %vm315_vm0, %v441_v33, %v312_v48 }
 0x1d0   :  { %v321_v51 = vsel %vm318_vm1, %v320_v50, %v316_v49 }
 0x1d1   :  { %v339_v52 = vsub.f32 1.0, %v321_v51  ;;  %v341_v54 = vmul.f32 %v321_v51, %v565_v7 }
 0x1d5   :  { %v443_v53 = vpop.eup %442 }
 0x1d6   :  { %v340_v46 = vmul.f32 %v443_v53, %v339_v52 }
 0x1d8   :  { %v342_v55 = vadd.f32 %v341_v54, %v340_v46 }
 0x1da   :  { %344 = vst.msk [vmem:[#allocation5] sm:$0x3] %vm343_vm2, %v342_v55 }
 0x1db   :  { %355 = dma.vmem_to_hbm [thread:$0]  %s351_s4, 32, %s353_s20, [#allocation6]  }
 0x1dc   :  { %468 = dma.done.wait [#allocation6], 32  }
 0x1dd   :  { %469 = vsyncadd [#allocation6], 4294967264 }
 0x1de   :  { %360 = vsyncpa [#allocation6], 1 }

// kernel: reference_encoder_forward.2
= control target key start
LH: loop header
LB: loop body
LE: loop exit
PB: predicated region body
PF: predicated region fallthrough
CT: control target
= control target key end

     0   :  { %s5442_s0 = inlined_call_operand.vmem [shape: bf16[2,128,16], index: 0, kind: input, shape index: {}]   ;;  %s5443_s1 = inlined_call_operand.hbm [shape: bf16[3,64,128], index: 1, kind: input, shape index: {}]   ;;  %s5444_s2 = inlined_call_operand.vmem [shape: bf16[3,16,256], index: 2, kind: input, shape index: {}]   ;;  %s5445_s3 = inlined_call_operand.vmem [shape: f32[1,256], index: 3, kind: input, shape index: {}]   ;;  %s5446_s4 = inlined_call_operand.hbm [shape: bf16[3,32,64], index: 4, kind: input, shape index: {}]   ;;  %s5447_s5 = inlined_call_operand.hbm [shape: bf16[3,256,128], index: 5, kind: input, shape index: {}]   ;;  %s5448_s6 = inlined_call_operand.hbm [shape: f32[1,128], index: 6, kind: input, shape index: {}]   ;;  %s5449_s7 = inlined_call_operand.hbm [shape: bf16[3,16,32], index: 7, kind: input, shape index: {}]   ;;  %s5450_s8 = inlined_call_operand.vmem [shape: bf16[3,128,128], index: 8, kind: input, shape index: {}]   ;;  %s5451_s9 = inlined_call_operand.hbm [shape: f32[1,128], index: 9, kind: input, shape index: {}]   ;;  %s5452_s10 = inlined_call_operand.vmem [shape: bf16[3,8,16], index: 10, kind: input, shape index: {}]   ;;  %s5453_s11 = inlined_call_operand.vmem [shape: bf16[3,128,64], index: 11, kind: input, shape index: {}]   ;;  %s5454_s12 = inlined_call_operand.hbm [shape: f32[1,64], index: 12, kind: input, shape index: {}]   ;;  %s5455_s13 = inlined_call_operand.hbm [shape: bf16[3,4,8], index: 13, kind: input, shape index: {}]   ;;  %s5456_s14 = inlined_call_operand.vmem [shape: bf16[3,64,128], index: 14, kind: input, shape index: {}]   ;;  %s5457_s15 = inlined_call_operand.hbm [shape: f32[1,128], index: 15, kind: input, shape index: {}]   ;;  %s5458_s16 = inlined_call_operand.vmem [shape: bf16[3,2,4], index: 16, kind: input, shape index: {}]   ;;  %s5459_s17 = inlined_call_operand.hbm [shape: bf16[3,128,128], index: 17, kind: input, shape index: {}]   ;;  %s5460_s18 = inlined_call_operand.hbm [shape: f32[1,128], index: 18, kind: input, shape index: {}]   ;;  %s5461_s19 = inlined_call_operand.vmem [shape: bf16[2,2,128], index: 19, kind: output, shape index: {}]  }
   0x1   :  { %5466 = sst [smem:[#allocation26_spill]] %s5442_s0 }
   0x2   :  { %5467 = sst [smem:[#allocation27_spill]] %s5443_s1 }
   0x3   :  { %5468 = sst [smem:[#allocation28_spill]] %s5444_s2 }
   0x4   :  { %5469 = sst [smem:[#allocation29_spill]] %s5445_s3 }
   0x5   :  { %5470 = sst [smem:[#allocation30_spill]] %s5446_s4 }
   0x6   :  { %5471 = sst [smem:[#allocation31_spill]] %s5448_s6 }
   0x7   :  { %5472 = sst [smem:[#allocation32_spill]] %s5451_s9 }
   0x8   :  { %5473 = sst [smem:[#allocation33_spill]] %s5461_s19 }
   0x9   :  { %24 = vsyncpa [#allocation3], 0 }
   0xa   :  { %25 = vsyncpa [#allocation5], 0 }
   0xb   :  { %26 = vsyncpa [#allocation8], 0 }
   0xc   :  { %27 = vsyncpa [#allocation11], 0 }
   0xd   :  { %28 = vsyncpa [#allocation14], 0 }
   0xe   :  { %29 = vsyncpa [#allocation17], 0  ;;  %s4956_s0 = smov 0  }
   0xf LB: > { %5474 = sst [smem:[#allocation25_spill]] %s4839_s0  ;;  %s4962_s30 = sadd.s32 4294967295, %s4839_s0   ;;  %s4839_s0 = sphi %s4956_s0, %s35_s0  }
  0x10   : > { %p3347_p0 = scmp.ge.s32.totalorder %s4839_s0, 1  ;;  %p470_p1 = scmp.lt.s32.totalorder %s4839_s0, 3 }
  0x11   : > { %p4429_p2 = scmp.eq.s32.totalorder %s4962_s30, 0  ;;  %s5475_s4 = sld [smem:[#allocation30_spill]] }
  0x12   : > { %p4970_p3 = pnand %p3347_p0, %p470_p1  ;;  %s5477_s6 = sld [smem:[#allocation31_spill]] }
  0x13   : > { %s4841_s25 = smov [#allocation4]   ;;  %s4842_s27 = smov [#allocation7]  }
  0x14   : > { %p4395_p4 = pneg %p4970_p3  ;;  %s503_s3 = sshll.u32 %s4841_s25, 4  ;;  %s504_s3 = int_to_ptr.vmem [resolvable:$true] %s503_s3 }
  0x15   : > { %s532_s28 = sshll.u32 %s4842_s27, 4  ;;  %s5479_s9 = sld [smem:[#allocation32_spill]]  ;;  %s533_s28 = int_to_ptr.vmem [resolvable:$true] %s532_s28 }
  0x16   : > { %p4981_p5 = pnand %p4429_p2, %p4395_p4  ;;  %s5464_s2 = smov 64  }
  0x17   : > { %s501_s1 = sshll.u32 %s5475_s4, 4  ;;  %s4844_s23 = smov 4   ;;  %s502_s1 = int_to_ptr.hbm [resolvable:$true] %s501_s1 }
  0x18   : > { %s530_s24 = sshll.u32 %s5477_s6, 4  ;;  %s4845_s25 = smov [#allocation10]   ;;  %s531_s24 = int_to_ptr.hbm [resolvable:$true] %s530_s24 }
  0x19   : > { %4401 = dma.hbm_to_vmem [thread:$0]  (!%p4981_p5), %s502_s1, 768, %s504_s3, [#allocation5], %s5464_s2, %s5464_s2, %s4844_s23  }
  0x1a   : > { %4407 = dma.hbm_to_vmem [thread:$0]  (!%p4981_p5), %s531_s24, 16, %s533_s28, [#allocation8]  }
  0x1b   : > { %s559_s21 = sshll.u32 %s5479_s9, 4  ;;  %s561_s4 = sshll.u32 %s4845_s25, 4  ;;  %s560_s21 = int_to_ptr.hbm [resolvable:$true] %s559_s21  ;;  %s562_s4 = int_to_ptr.vmem [resolvable:$true] %s561_s4 }
  0x1c   : > { %s588_s0 = sshll.u32 %s5455_s13, 4  ;;  %s4846_s29 = smov [#allocation13]   ;;  %s589_s0 = int_to_ptr.hbm [resolvable:$true] %s588_s0 }
  0x1d   : > { %4413 = dma.hbm_to_vmem [thread:$0]  (!%p4981_p5), %s560_s21, 16, %s562_s4, [#allocation11]  }
  0x1e   : > { %s590_s20 = sshll.u32 %s4846_s29, 4  ;;  %s620_s1 = sshll.u32 %s5459_s17, 4  ;;  %s591_s20 = int_to_ptr.vmem [resolvable:$true] %s590_s20  ;;  %s621_s1 = int_to_ptr.hbm [resolvable:$true] %s620_s1 }
  0x1f   : > { %s4847_s24 = smov 32   ;;  %s4848_s3 = smov 2  }
  0x20   : > { %4419 = dma.hbm_to_vmem [thread:$0]  (!%p4981_p5), %s589_s0, 96, %s591_s20, [#allocation14], %s4847_s24, %s4847_s24, %s4848_s3  }
  0x21   : > { %s4849_s6 = smov [#allocation16]   ;;  %s5480_s2 = sld [smem:[#allocation27_spill]] }
  0x22   : > { %s622_s28 = sshll.u32 %s4849_s6, 4  ;;  %s5481_s21 = smov 64   ;;  %s623_s28 = int_to_ptr.vmem [resolvable:$true] %s622_s28 }
  0x23   : > { %4425 = dma.hbm_to_vmem [thread:$0]  (!%p4981_p5), %s621_s1, 3072, %s623_s28, [#allocation17], %s5481_s21, %s5481_s21, %s4844_s23  }
  0x24   : > { %s515_s29 = sshll.u32 %s5447_s5, 4  ;;  %s4850_s0 = smov [#allocation2]   ;;  %s516_s29 = int_to_ptr.hbm [resolvable:$true] %s515_s29 }
  0x25   : > { %s483_s20 = sshll.u32 %s4850_s0, 4  ;;  %s541_s1 = sshll.u32 %s5449_s7, 4  ;;  %s484_s20 = int_to_ptr.vmem [resolvable:$true] %s483_s20  ;;  %s542_s1 = int_to_ptr.hbm [resolvable:$true] %s541_s1 }
  0x26   : > { %s577_s27 = sshll.u32 %s5454_s12, 4  ;;  %s4852_s9 = smov [#allocation9]   ;;  %s578_s27 = int_to_ptr.hbm [resolvable:$true] %s577_s27 }
  0x27   : > { %s481_s4 = sshll.u32 %s5480_s2, 4  ;;  %s4851_s2 = smov [#allocation6]   ;;  %s482_s4 = int_to_ptr.hbm [resolvable:$true] %s481_s4 }
  0x28   : > { %4398 = dma.hbm_to_vmem [thread:$0]  (!%p4981_p5), %s482_s4, 1536, %s484_s20, [#allocation3], %s5481_s21, %s5481_s21, %s4844_s23  }
  0x29   : > { %s517_s24 = sshll.u32 %s4851_s2, 4  ;;  %s543_s4 = sshll.u32 %s4852_s9, 4  ;;  %s518_s24 = int_to_ptr.vmem [resolvable:$true] %s517_s24  ;;  %s544_s4 = int_to_ptr.vmem [resolvable:$true] %s543_s4 }
  0x2a   : > { %4404 = dma.hbm_to_vmem [thread:$0]  (!%p4981_p5), %s516_s29, 6144, %s518_s24, [#allocation5], %s5481_s21, %s5481_s21, %s4844_s23  }
  0x2b   : > { %4410 = dma.hbm_to_vmem [thread:$0]  (!%p4981_p5), %s542_s1, 384, %s544_s4, [#allocation8], %s5481_s21, %s5481_s21, %s4844_s23  }
  0x2c   : > { %s4853_s19 = smov [#allocation12]   ;;  %s606_s29 = sshll.u32 %s5457_s15, 4  ;;  %s607_s29 = int_to_ptr.hbm [resolvable:$true] %s606_s29 }
  0x2d   : > { %s579_s0 = sshll.u32 %s4853_s19, 4  ;;  %s635_s6 = sshll.u32 %s5460_s18, 4  ;;  %s580_s0 = int_to_ptr.vmem [resolvable:$true] %s579_s0  ;;  %s636_s6 = int_to_ptr.hbm [resolvable:$true] %s635_s6 }
  0x2e   : > { %4416 = dma.hbm_to_vmem [thread:$0]  (!%p4981_p5), %s578_s27, 16, %s580_s0, [#allocation11]  }
  0x2f   : > { %s4854_s28 = smov [#allocation15]   ;;  %s4855_s23 = smov [#allocation18]  }
  0x30   : > { %s608_s25 = sshll.u32 %s4854_s28, 4  ;;  %s637_s21 = sshll.u32 %s4855_s23, 4  ;;  %s609_s25 = int_to_ptr.vmem [resolvable:$true] %s608_s25  ;;  %s638_s21 = int_to_ptr.vmem [resolvable:$true] %s637_s21 }
  0x31   : > { %4422 = dma.hbm_to_vmem [thread:$0]  (!%p4981_p5), %s607_s29, 16, %s609_s25, [#allocation14]  }
  0x32   : > { %4428 = dma.hbm_to_vmem [thread:$0]  (!%p4981_p5), %s636_s6, 16, %s638_s21, [#allocation17]  }
  0x33   : > { %658 = sbr.rel (%p4970_p3) target bundleno = 2222 (0x8ae), region = 96 }
  0x38   : > { %4814 = dma.done.wait (%p4429_p2), [#allocation3], 1536  }
  0x39   : > { %4816 = vsyncadd (%p4429_p2), [#allocation3], 4294965760 }
  0x3a   : > { %4818 = dma.done.wait (%p4429_p2), [#allocation5], 6912  }
  0x3b   : > { %4820 = vsyncadd (%p4429_p2), [#allocation5], 4294960384 }
  0x3c   : > { %4822 = dma.done.wait (%p4429_p2), [#allocation8], 400  }
  0x3d   : > { %4824 = vsyncadd (%p4429_p2), [#allocation8], 4294966896 }
  0x3e   : > { %4826 = dma.done.wait (%p4429_p2), [#allocation11], 32  }
  0x3f   : > { %4828 = vsyncadd (%p4429_p2), [#allocation11], 4294967264 }
  0x40   : > { %4830 = dma.done.wait (%p4429_p2), [#allocation14], 112  }
  0x41   : > { %4832 = vsyncadd (%p4429_p2), [#allocation14], 4294967184 }
  0x42   : > { %4834 = dma.done.wait (%p4429_p2), [#allocation17], 3088  }
  0x43   : > { %4836 = vsyncadd (%p4429_p2), [#allocation17], 4294964208  ;;  %p763_p6 = scmp.lt.s32.totalorder %s4962_s30, 1  ;;  %s5482_s27 = sld [smem:[#allocation26_spill]]  ;;  %v4192_v8 = vld [vmem:[#allocation2] sm:$0xff]  ;;  %v4193_v10 = vld [vmem:[#allocation2 + $0x8] sm:$0xff] }
  0x44   : > { %v4198_v9 = vld [vmem:[#allocation2 + $0x20] sm:$0xff]  ;;  %v4199_v11 = vld [vmem:[#allocation2 + $0x28] sm:$0xff]  ;;  %v4194_v12 = vld [vmem:[#allocation2 + $0x10] sm:$0xff]  ;;  %s5483_s0 = sld [smem:[#allocation28_spill]]  ;;  %vm982_vm0 = vcmask 130048   ;;  %vm1358_vm1 = vcmask 523264  }
  0x45   : > { %s5489_s30 = smov (!%p763_p6, %s4962_s30), 1  ;;  %v4200_v13 = vld [vmem:[#allocation2 + $0x30] sm:$0xff]  ;;  %v4195_v14 = vld [vmem:[#allocation2 + $0x18] sm:$0xff]  ;;  %v4204_v16 = vld [vmem:[#allocation2 + $0x40] sm:$0xff]  ;;  %s5485_s23 = sld [smem:[#allocation29_spill]]  ;;  %vm2058_vm2 = vcmask 261120  }
  0x46   : > { %s4183_s22 = sshll.u32 %s5489_s30, 6  ;;  %v4201_v15 = vld [vmem:[#allocation2 + $0x38] sm:$0xff]  ;;  %v4205_v17 = vld [vmem:[#allocation2 + $0x48] sm:$0xff]  ;;  %v4206_v18 = vld [vmem:[#allocation2 + $0x50] sm:$0xff]  ;;  %vm2678_vm3 = vcmask 1043456   ;;  %vm2674_vm4 = vcmask 64512  }
  0x47   : > { %v4207_v25 = vld [vmem:[#allocation2 + $0x58] sm:$0xff]  ;;  %vm2893_vm5 = vcmask 1041408   ;;  %vm2889_vm6 = vcmask 31744   ;;  %s5486_s25 = sld [smem:[#allocation33_spill]] }
  0x49   : > { %s767_s9 = scalar_lea.vmem %s5482_s27, %s4183_s22 }
  0x4a   : > { %v4191_v0 = vld [vmem:[%s767_s9 + $0x38] sm:$0xff]  ;;  %v4190_v1 = vld [vmem:[%s767_s9 + $0x30] sm:$0xff]  ;;  %v4189_v2 = vld [vmem:[%s767_s9 + $0x28] sm:$0xff]  ;;  %s5484_s20 = smov %s5483_s0 }
  0x4b   : > { %868 = vmatpush.bf16.msra.mxu0 %v4191_v0  ;;  %936 = vmatpush.bf16.msra.mxu1 %v4191_v0  ;;  %v4188_v3 = vld [vmem:[%s767_s9 + $0x20] sm:$0xff]  ;;  %v4187_v4 = vld [vmem:[%s767_s9 + $0x18] sm:$0xff]  ;;  %v4186_v5 = vld [vmem:[%s767_s9 + $0x10] sm:$0xff] }
  0x4c   : > { %v4185_v6 = vld [vmem:[%s767_s9 + $0x8] sm:$0xff]  ;;  %v4184_v7 = vld [vmem:[%s767_s9] sm:$0xff]  ;;  %v3442_v19 = vld [vmem:[%s5483_s0 + $0x10] sm:$0xf] }
  0x4d   : > { %v4203_v20 = vld [vmem:[%s5484_s20 + $0x14] sm:$0xf0]  ;;  %v4202_v21 = vld [vmem:[%s5484_s20 + $0x14] sm:$0xf]  ;;  %v3444_v23 = vld [vmem:[%s5484_s20 + $0x18] sm:$0xf0] }
  0x4e   : > { %v3443_v22 = vor.u32 %v4203_v20, %v3442_v19  ;;  %v3447_v24 = vor.u32 %v4202_v21, %v3444_v23  ;;  %v3458_v28 = vld [vmem:[%s5484_s20] sm:$0xf]  ;;  %v4197_v29 = vld [vmem:[%s5484_s20 + $0x4] sm:$0xf0]  ;;  %v4196_v41 = vld [vmem:[%s5484_s20 + $0x4] sm:$0xf] }
  0x4f   : > { %869 = vmatpush.bf16.msra.mxu0 %v4190_v1  ;;  %937 = vmatpush.bf16.msra.mxu1 %v4190_v1  ;;  %v3459_v30 = vor.u32 %v4197_v29, %v3458_v28  ;;  %v3460_v42 = vld [vmem:[%s5484_s20 + $0x8] sm:$0xf0]  ;;  %v3492_v47 = vld [vmem:[%s5484_s20 + $0x20] sm:$0xf]  ;;  %v4209_v48 = vld [vmem:[%s5484_s20 + $0x24] sm:$0xf0] }
  0x50   : > { %1002 = vmatpush.bf16.msra.mxu2 %v3443_v22  ;;  %1031 = vmatpush.bf16.msra.mxu3 %v3447_v24  ;;  %v3463_v43 = vor.u32 %v4196_v41, %v3460_v42  ;;  %v3493_v49 = vor.u32 %v4209_v48, %v3492_v47  ;;  %v4208_v56 = vld [vmem:[%s5484_s20 + $0x24] sm:$0xf]  ;;  %v3494_v57 = vld [vmem:[%s5484_s20 + $0x28] sm:$0xf0] }
  0x51   : > { %v3497_v58 = vor.u32 %v4208_v56, %v3494_v57 }
  0x53   : > { %870 = vmatpush.bf16.msra.mxu0 %v4189_v2  ;;  %938 = vmatpush.bf16.msra.mxu1 %v4189_v2 }
  0x54   : > { %1082 = vmatpush.bf16.msrb.mxu2 %v3459_v30  ;;  %1111 = vmatpush.bf16.msrb.mxu3 %v3463_v43 }
  0x57   : > { %871 = vmatpush.bf16.msra.mxu0 %v4188_v3  ;;  %939 = vmatpush.bf16.msra.mxu1 %v4188_v3 }
  0x5b   : > { %872 = vmatpush.bf16.msra.mxu0 %v4187_v4  ;;  %940 = vmatpush.bf16.msra.mxu1 %v4187_v4 }
  0x5f   : > { %873 = vmatpush.bf16.msra.mxu0 %v4186_v5  ;;  %941 = vmatpush.bf16.msra.mxu1 %v4186_v5 }
  0x63   : > { %874 = vmatpush.bf16.msra.mxu0 %v4185_v6  ;;  %942 = vmatpush.bf16.msra.mxu1 %v4185_v6 }
  0x67   : > { %875 = vmatpush.bf16.msra.mxu0 %v4184_v7  ;;  %943 = vmatpush.bf16.msra.mxu1 %v4184_v7 }
  0x6a   : > { %876 = vmatmul.bf16.vlgmr.msra.gmra.mxu0 %v4192_v8  ;;  %944 = vmatmul.bf16.vlgmr.msra.gmra.mxu1 %v4198_v9 }
  0x6b   : > { %1166 = vmatpush.bf16.msrb.mxu0 %v4191_v0  ;;  %1231 = vmatpush.bf16.msrb.mxu1 %v3493_v49 }
  0x6f   : > { %1167 = vmatpush.bf16.msrb.mxu0 %v4190_v1 }
  0x73   : > { %1168 = vmatpush.bf16.msrb.mxu0 %v4189_v2 }
  0x77   : > { %1169 = vmatpush.bf16.msrb.mxu0 %v4188_v3 }
  0x7a   : > { %881 = vmatmul.bf16.gmra.mxu0 %v4193_v10  ;;  %949 = vmatmul.bf16.gmra.mxu1 %v4199_v11 }
  0x7b   : > { %1170 = vmatpush.bf16.msrb.mxu0 %v4187_v4 }
  0x7f   : > { %1171 = vmatpush.bf16.msrb.mxu0 %v4186_v5 }
  0x83   : > { %1172 = vmatpush.bf16.msrb.mxu0 %v4185_v6 }
  0x87   : > { %1173 = vmatpush.bf16.msrb.mxu0 %v4184_v7 }
  0x8a   : > { %886 = vmatmul.bf16.gmra.mxu0 %v4194_v12  ;;  %954 = vmatmul.bf16.gmra.mxu1 %v4200_v13 }
  0x9a   : > { %891 = vmatmul.bf16.gmra.mxu0 %v4195_v14  ;;  %959 = vmatmul.bf16.gmra.mxu1 %v4201_v15 }
  0xaa   : > { %1174 = vmatmul.bf16.vlgmr.msrb.gmra.mxu0 %v4204_v16 }
  0xba   : > { %1179 = vmatmul.bf16.gmra.mxu0 %v4205_v17 }
  0xca   : > { %1184 = vmatmul.bf16.gmra.mxu0 %v4206_v18 }
  0xda   : > { %1189 = vmatmul.bf16.gmra.mxu0 %v4207_v25 }
  0xe7   : > { %v877_v26 = vpop.f32.mrf.mxu0  ;;  %v945_v27 = vpop.f32.mrf.mxu1 }
  0xef   : > { %v879_v31 = vpop.f32.mrf.mxu0  ;;  %v947_v32 = vpop.f32.mrf.mxu1 }
  0xf0   : > { %v965_v33 = vpack.c.bf16 %v947_v32, %v945_v27  ;;  %v897_v60 = vpack.c.bf16 %v879_v31, %v877_v26 }
  0xf2   : > { %3448 = vmatmul.msk.bf16.vlgmr.msra.gmra.mxu2 %vm982_vm0, %v965_v33  ;;  %3452 = vmatmul.msk.bf16.vlgmr.msra.gmra.mxu3 %vm982_vm0, %v965_v33 }
  0xf3   : > { %1260 = vmatpush.bf16.msra.mxu2 %v3497_v58 }
  0xf7   : > { %v882_v34 = vpop.f32.mrf.mxu0  ;;  %v950_v35 = vpop.f32.mrf.mxu1 }
  0xff   : > { %v884_v36 = vpop.f32.mrf.mxu0  ;;  %v952_v37 = vpop.f32.mrf.mxu1 }
 0x100   : > { %v966_v38 = vpack.c.bf16 %v952_v37, %v950_v35  ;;  %v898_v0 = vpack.c.bf16 %v884_v36, %v882_v34 }
 0x102   : > { %3449 = vmatmul.msk.bf16.gmra.mxu2 %vm982_vm0, %v966_v38  ;;  %3453 = vmatmul.msk.bf16.gmra.mxu3 %vm982_vm0, %v966_v38 }
 0x107   : > { %v887_v39 = vpop.f32.mrf.mxu0  ;;  %v955_v40 = vpop.f32.mrf.mxu1 }
 0x10f   : > { %v889_v44 = vpop.f32.mrf.mxu0  ;;  %v957_v45 = vpop.f32.mrf.mxu1 }
 0x110   : > { %v967_v46 = vpack.c.bf16 %v957_v45, %v955_v40  ;;  %v899_v4 = vpack.c.bf16 %v889_v44, %v887_v39 }
 0x112   : > { %3450 = vmatmul.msk.bf16.gmra.mxu2 %vm982_vm0, %v967_v46  ;;  %3454 = vmatmul.msk.bf16.gmra.mxu3 %vm982_vm0, %v967_v46  ;;  %v5160_v46 = vld [vmem:[%s5485_s23] sm:$0x3]  ;;  %s770_s23 = scalar_lea.vmem %s5486_s25, %s5489_s30 }
 0x117   : > { %v892_v50 = vpop.f32.mrf.mxu0  ;;  %v960_v51 = vpop.f32.mrf.mxu1 }
 0x11f   : > { %v894_v52 = vpop.f32.mrf.mxu0  ;;  %v962_v53 = vpop.f32.mrf.mxu1 }
 0x120   : > { %v968_v54 = vpack.c.bf16 %v962_v53, %v960_v51  ;;  %v900_v8 = vpack.c.bf16 %v894_v52, %v892_v50  ;;  %v1300_v52 = vperm.slane %v5160_v46, 0 }
 0x122   : > { %3451 = vmatmul.msk.bf16.gmra.mxu2 %vm982_vm0, %v968_v54  ;;  %3455 = vmatmul.msk.bf16.gmra.mxu3 %vm982_vm0, %v968_v54 }
 0x127   : > { %v1175_v55 = vpop.f32.mrf.mxu0 }
 0x12f   : > { %v1177_v59 = vpop.f32.mrf.mxu0 }
 0x130   : > { %v1195_v61 = vpack.c.bf16 %v1177_v59, %v1175_v55 }
 0x132   : > { %3464 = vmatmul.msk.bf16.vlgmr.msrb.gmra.mxu2 %vm982_vm0, %v897_v60  ;;  %3468 = vmatmul.msk.bf16.vlgmr.msrb.gmra.mxu3 %vm982_vm0, %v897_v60 }
 0x133   : > { %3498 = vmatmul.msk.bf16.vlgmr.msrb.gmra.mxu1 %vm982_vm0, %v1195_v61 }
 0x137   : > { %v1180_v62 = vpop.f32.mrf.mxu0 }
 0x13f   : > { %v1182_v63 = vpop.f32.mrf.mxu0 }
 0x140   : > { %v1196_v1 = vpack.c.bf16 %v1182_v63, %v1180_v62 }
 0x142   : > { %3465 = vmatmul.msk.bf16.gmra.mxu2 %vm982_vm0, %v898_v0  ;;  %3469 = vmatmul.msk.bf16.gmra.mxu3 %vm982_vm0, %v898_v0 }
 0x143   : > { %3499 = vmatmul.msk.bf16.gmra.mxu1 %vm982_vm0, %v1196_v1 }
 0x147   : > { %v1185_v2 = vpop.f32.mrf.mxu0 }
 0x14f   : > { %v1187_v3 = vpop.f32.mrf.mxu0 }
 0x150   : > { %v1197_v5 = vpack.c.bf16 %v1187_v3, %v1185_v2 }
 0x152   : > { %3466 = vmatmul.msk.bf16.gmra.mxu2 %vm982_vm0, %v899_v4  ;;  %3470 = vmatmul.msk.bf16.gmra.mxu3 %vm982_vm0, %v899_v4 }
 0x153   : > { %3500 = vmatmul.msk.bf16.gmra.mxu1 %vm982_vm0, %v1197_v5 }
 0x157   : > { %v1190_v6 = vpop.f32.mrf.mxu0 }
 0x15f   : > { %v1192_v7 = vpop.f32.mrf.mxu0 }
 0x160   : > { %v1198_v9 = vpack.c.bf16 %v1192_v7, %v1190_v6 }
 0x162   : > { %3467 = vmatmul.msk.bf16.gmra.mxu2 %vm982_vm0, %v900_v8  ;;  %3471 = vmatmul.msk.bf16.gmra.mxu3 %vm982_vm0, %v900_v8 }
 0x163   : > { %3501 = vmatmul.msk.bf16.gmra.mxu1 %vm982_vm0, %v1198_v9 }
 0x172   : > { %3502 = vmatmul.msk.bf16.vlgmr.msra.gmra.mxu2 %vm982_vm0, %v1195_v61 }
 0x175   : > { %v1004_v10 = vpop.f32.mrf.mxu2  ;;  %v1033_v11 = vpop.f32.mrf.mxu3 }
 0x17d   : > { %v1006_v12 = vpop.f32.mrf.mxu2  ;;  %v5140_v13 = vpop.f32.mrf.mxu3 }
 0x182   : > { %3503 = vmatmul.msk.bf16.gmra.mxu2 %vm982_vm0, %v1196_v1 }
 0x185   : > { %v1009_v14 = vpop.f32.mrf.mxu2  ;;  %v5143_v15 = vpop.f32.mrf.mxu3 }
 0x18d   : > { %v1011_v16 = vpop.f32.mrf.mxu2  ;;  %v5145_v17 = vpop.f32.mrf.mxu3 }
 0x192   : > { %3504 = vmatmul.msk.bf16.gmra.mxu2 %vm982_vm0, %v1197_v5 }
 0x195   : > { %v1014_v18 = vpop.f32.mrf.mxu2  ;;  %v5148_v19 = vpop.f32.mrf.mxu3 }
 0x19d   : > { %v1016_v20 = vpop.f32.mrf.mxu2  ;;  %v5150_v21 = vpop.f32.mrf.mxu3 }
 0x1a2   : > { %3505 = vmatmul.msk.bf16.gmra.mxu2 %vm982_vm0, %v1198_v9 }
 0x1a5   : > { %v1019_v22 = vpop.f32.mrf.mxu2  ;;  %v5153_v23 = vpop.f32.mrf.mxu3 }
 0x1ad   : > { %v1021_v24 = vpop.f32.mrf.mxu2  ;;  %v5155_v25 = vpop.f32.mrf.mxu3 }
 0x1b0   : > { %v1233_v26 = vpop.f32.mrf.mxu1 }
 0x1b5   : > { %v1084_v27 = vpop.f32.mrf.mxu2  ;;  %v1113_v28 = vpop.f32.mrf.mxu3 }
 0x1b6   : > { %v1085_v29 = vadd.f32 %v1084_v27, %v1004_v10  ;;  %v1114_v30 = vadd.f32 %v1113_v28, %v1033_v11 }
 0x1b8   : > { %v1282_v31 = vadd.f32 %v1233_v26, %v1085_v29  ;;  %v1235_v32 = vpop.f32.mrf.mxu1 }
 0x1bd   : > { %v1086_v33 = vpop.f32.mrf.mxu2  ;;  %v5162_v47 = vpop.f32.mrf.mxu3 }
 0x1be   : > { %v1087_v60 = vadd.f32 %v1086_v33, %v1006_v12 }
 0x1c0   : > { %v1238_v34 = vpop.f32.mrf.mxu1  ;;  %v1284_v4 = vadd.f32 %v1235_v32, %v1087_v60 }
 0x1c2   : > { %v1306_v12 = vadd.f32 %v1300_v52, %v1284_v4 }
 0x1c4   : > { %v1322_v27 = vmax.f32 %v1306_v12, 0.0 }
 0x1c5   : > { %v1089_v35 = vpop.f32.mrf.mxu2  ;;  %v5169_v10 = vpop.f32.mrf.mxu3 }
 0x1c6   : > { %v1090_v56 = vadd.f32 %v1089_v35, %v1009_v14  ;;  %v4243_v35 = vld [vmem:[#allocation6 + $0xe8] sm:$0xff] }
 0x1c8   : > { %v1240_v36 = vpop.f32.mrf.mxu1  ;;  %v1286_v0 = vadd.f32 %v1238_v34, %v1090_v56  ;;  %v4244_v34 = vld [vmem:[#allocation6 + $0xf0] sm:$0xff] }
 0x1ca   : > { %v1308_v11 = vadd.f32 %v1300_v52, %v1286_v0 }
 0x1cd   : > { %v1091_v37 = vpop.f32.mrf.mxu2  ;;  %v1120_v29 = vpop.f32.mrf.mxu3 }
 0x1ce   : > { %v1092_v53 = vadd.f32 %v1091_v37, %v1011_v16 }
 0x1d0   : > { %v1243_v38 = vpop.f32.mrf.mxu1  ;;  %v1288_v61 = vadd.f32 %v1240_v36, %v1092_v53 }
 0x1d2   : > { %v1310_v6 = vadd.f32 %v1300_v52, %v1288_v61 }
 0x1d5   : > { %v1094_v39 = vpop.f32.mrf.mxu2  ;;  %v1123_v36 = vpop.f32.mrf.mxu3 }
 0x1d6   : > { %v1095_v48 = vadd.f32 %v1094_v39, %v1014_v18  ;;  %v1326_v18 = vmax.f32 %v1310_v6, 0.0  ;;  %v4241_v39 = vld [vmem:[#allocation6 + $0xd8] sm:$0xff] }
 0x1d8   : > { %v1245_v40 = vpop.f32.mrf.mxu1  ;;  %v1290_v57 = vadd.f32 %v1243_v38, %v1095_v48  ;;  %v4242_v38 = vld [vmem:[#allocation6 + $0xe0] sm:$0xff] }
 0x1da   : > { %v1312_v1 = vadd.f32 %v1300_v52, %v1290_v57  ;;  %v1124_v57 = vadd.f32 %v1123_v36, %v5148_v19  ;;  %v1116_v19 = vadd.f32 %v5162_v47, %v5140_v13  ;;  %v4217_v36 = vld [vmem:[#allocation6 + $0x28] sm:$0xff] }
 0x1dc   : > { %v1328_v14 = vmax.f32 %v1312_v1, 0.0  ;;  %v1119_v1 = vadd.f32 %v5169_v10, %v5143_v15 }
 0x1dd   : > { %v1096_v41 = vpop.f32.mrf.mxu2 }
 0x1de   : > { %v1097_v45 = vadd.f32 %v1096_v41, %v1016_v20  ;;  %v1304_v20 = vadd.f32 %v1300_v52, %v1282_v31  ;;  %v5185_v31 = vld [vmem:[#allocation4] sm:$0xff]  ;;  %v5193_v41 = vld [vmem:[#allocation4 + $0x10] sm:$0xff] }
 0x1e0   : > { %v1248_v42 = vpop.f32.mrf.mxu1  ;;  %v1292_v54 = vadd.f32 %v1245_v40, %v1097_v45  ;;  %v1320_v28 = vmax.f32 %v1304_v20, 0.0  ;;  %v5191_v40 = vld [vmem:[#allocation4 + $0x8] sm:$0xff]  ;;  %v4239_v45 = vld [vmem:[#allocation6 + $0xc8] sm:$0xff] }
 0x1e2   : > { %v1314_v62 = vadd.f32 %v1300_v52, %v1292_v54  ;;  %v5183_v32 = vpack.c.bf16 %v1322_v27, %v1320_v28  ;;  %v4237_v27 = vld [vmem:[#allocation6 + $0xb8] sm:$0xff] }
 0x1e4   : > { %v1330_v9 = vmax.f32 %v1314_v62, 0.0  ;;  %v1121_v62 = vadd.f32 %v1120_v29, %v5145_v17  ;;  %v4236_v29 = vld [vmem:[#allocation6 + $0xb0] sm:$0xff] }
 0x1e5   : > { %v1099_v43 = vpop.f32.mrf.mxu2 }
 0x1e6   : > { %v1100_v44 = vadd.f32 %v1099_v43, %v1019_v22  ;;  %v5173_v16 = vpack.c.bf16 %v1330_v9, %v1328_v14  ;;  %v1324_v22 = vmax.f32 %v1308_v11, 0.0 }
 0x1e8   : > { %v1294_v49 = vadd.f32 %v1248_v42, %v1100_v44  ;;  %v1250_v50 = vpop.f32.mrf.mxu1  ;;  %v5179_v26 = vpack.c.bf16 %v1326_v18, %v1324_v22  ;;  %v1125_v42 = vpop.f32.mrf.mxu3  ;;  %v4240_v44 = vld [vmem:[#allocation6 + $0xd0] sm:$0xff] }
 0x1ea   : > { %v1316_v58 = vadd.f32 %v1300_v52, %v1294_v49  ;;  %v4238_v49 = vld [vmem:[#allocation6 + $0xc0] sm:$0xff] }
 0x1ec   : > { %v1332_v2 = vmax.f32 %v1316_v58, 0.0 }
 0x1ed   : > { %v1101_v51 = vpop.f32.mrf.mxu2 }
 0x1ee   : > { %v1102_v55 = vadd.f32 %v1101_v51, %v1021_v24 }
 0x1f0   : > { %v1296_v59 = vadd.f32 %v1250_v50, %v1102_v55  ;;  %v1128_v50 = vpop.f32.mrf.mxu3  ;;  %v1126_v55 = vadd.f32 %v1125_v42, %v5150_v21  ;;  %v4214_v42 = vld [vmem:[#allocation6 + $0x10] sm:$0xff] }
 0x1f1   : > { %v1129_v53 = vadd.f32 %v1128_v50, %v5153_v23 }
 0x1f2   : > { %v1318_v63 = vadd.f32 %v1300_v52, %v1296_v59  ;;  %v5199_v52 = vld [vmem:[#allocation4 + $0x18] sm:$0xff]  ;;  %v1301_v59 = vperm.slane %v5160_v46, 1 }
 0x1f4   : > { %v1334_v3 = vmax.f32 %v1318_v63, 0.0 }
 0x1f5   : > { %v1262_v5 = vpop.f32.mrf.mxu2 }
 0x1f6   : > { %v5165_v7 = vadd.f32 %v1262_v5, %v1114_v30  ;;  %v5167_v8 = vpack.c.bf16 %v1334_v3, %v1332_v2  ;;  %v4245_v30 = vld [vmem:[#allocation6 + $0xf8] sm:$0xff] }
 0x1f8   : > { %1369 = vmatpush.bf16.msra.mxu3 %v5167_v8  ;;  %1464 = vmatpush.bf16.msra.mxu1 %v5167_v8  ;;  %v1130_v54 = vpop.f32.mrf.mxu3  ;;  %v1305_v20 = vadd.f32 %v1301_v59, %v5165_v7  ;;  %v4235_v7 = vld [vmem:[#allocation6 + $0xa8] sm:$0xff] }
 0x1f9   : > { %v1131_v58 = vadd.f32 %v1130_v54, %v5155_v25 }
 0x1fc   : > { %1370 = vmatpush.bf16.msra.mxu3 %v5173_v16  ;;  %1465 = vmatpush.bf16.msra.mxu1 %v5173_v16 }
 0x1fd   : > { %v5177_v24 = vpop.f32.mrf.mxu2 }
 0x1fe   : > { %v1285_v6 = vadd.f32 %v5177_v24, %v1116_v19  ;;  %v1321_v24 = vmax.f32 %v1305_v20, 0.0  ;;  %v4251_v20 = vld [vmem:[#allocation6 + $0x118] sm:$0xff] }
 0x200   : > { %1371 = vmatpush.bf16.msra.mxu3 %v5179_v26  ;;  %1466 = vmatpush.bf16.msra.mxu1 %v5179_v26  ;;  %v1307_v15 = vadd.f32 %v1301_v59, %v1285_v6 }
 0x202   : > { %v1323_v47 = vmax.f32 %v1307_v15, 0.0  ;;  %v4253_v15 = vld [vmem:[#allocation6 + $0x128] sm:$0xff] }
 0x204   : > { %1372 = vmatpush.bf16.msra.mxu3 %v5183_v32  ;;  %1467 = vmatpush.bf16.msra.mxu1 %v5183_v32  ;;  %v1337_v28 = vpack.c.bf16 %v1323_v47, %v1321_v24  ;;  %v4250_v47 = vld [vmem:[#allocation6 + $0x110] sm:$0xff] }
 0x205   : > { %v1267_v33 = vpop.f32.mrf.mxu2 }
 0x206   : > { %v1287_v4 = vadd.f32 %v1267_v33, %v1119_v1  ;;  %v4219_v33 = vld [vmem:[#allocation6 + $0x38] sm:$0xff] }
 0x207   : > { %3514 = vmatmul.msk.bf16.vlgmr.msra.gmra.mxu3 %vm1358_vm1, %v5185_v31  ;;  %3526 = vmatmul.msk.bf16.vlgmr.msra.gmra.mxu1 %vm1358_vm1, %v5193_v41 }
 0x208   : > { %1650 = vmatpush.bf16.msrb.mxu1 %v4245_v30  ;;  %v1309_v14 = vadd.f32 %v1301_v59, %v1287_v4  ;;  %v4234_v30 = vld [vmem:[#allocation6 + $0xa0] sm:$0xff]  ;;  %1765 = vmatpush.bf16.msrb.mxu2 %v4219_v33 }
 0x20a   : > { %v1325_v13 = vmax.f32 %v1309_v14, 0.0 }
 0x20c   : > { %1651 = vmatpush.bf16.msrb.mxu1 %v4244_v34  ;;  %v4218_v34 = vld [vmem:[#allocation6 + $0x30] sm:$0xff] }
 0x20d   : > { %v1269_v37 = vpop.f32.mrf.mxu2  ;;  %1766 = vmatpush.bf16.msrb.mxu2 %v4218_v34  ;;  %v4259_v34 = vld [vmem:[#allocation6 + $0x158] sm:$0xff] }
 0x20e   : > { %v1289_v2 = vadd.f32 %v1269_v37, %v1121_v62  ;;  %v4232_v37 = vld [vmem:[#allocation6 + $0x90] sm:$0xff] }
 0x210   : > { %1652 = vmatpush.bf16.msrb.mxu1 %v4243_v35  ;;  %v1311_v9 = vadd.f32 %v1301_v59, %v1289_v2  ;;  %v4233_v35 = vld [vmem:[#allocation6 + $0x98] sm:$0xff] }
 0x211   : > { %1767 = vmatpush.bf16.msrb.mxu2 %v4217_v36 }
 0x212   : > { %v1327_v10 = vmax.f32 %v1311_v9, 0.0  ;;  %v4255_v9 = vld [vmem:[#allocation6 + $0x138] sm:$0xff] }
 0x214   : > { %1653 = vmatpush.bf16.msrb.mxu1 %v4242_v38  ;;  %v1339_v22 = vpack.c.bf16 %v1327_v10, %v1325_v13  ;;  %v4231_v38 = vld [vmem:[#allocation6 + $0x88] sm:$0xff]  ;;  %v4263_v13 = vld [vmem:[#allocation6 + $0x178] sm:$0xff] }
 0x215   : > { %v1272_v43 = vpop.f32.mrf.mxu2 }
 0x216   : > { %v1291_v63 = vadd.f32 %v1272_v43, %v1124_v57  ;;  %v4212_v43 = vld [vmem:[#allocation6] sm:$0xff] }
 0x217   : > { %3515 = vmatmul.msk.bf16.gmra.mxu3 %vm1358_vm1, %v5191_v40  ;;  %3527 = vmatmul.msk.bf16.gmra.mxu1 %vm1358_vm1, %v5199_v52 }
 0x218   : > { %1654 = vmatpush.bf16.msrb.mxu1 %v4241_v39  ;;  %v1313_v25 = vadd.f32 %v1301_v59, %v1291_v63  ;;  %v4215_v39 = vld [vmem:[#allocation6 + $0x18] sm:$0xff]  ;;  %v4246_v63 = vld [vmem:[#allocation4 + $0x20] sm:$0xff] }
 0x21a   : > { %v1329_v12 = vmax.f32 %v1313_v25, 0.0 }
 0x21c   : > { %1655 = vmatpush.bf16.msrb.mxu1 %v4240_v44  ;;  %v4227_v44 = vld [vmem:[#allocation6 + $0x78] sm:$0xff] }
 0x21d   : > { %v1274_v48 = vpop.f32.mrf.mxu2 }
 0x21e   : > { %v1293_v60 = vadd.f32 %v1274_v48, %v1126_v55  ;;  %v4225_v48 = vld [vmem:[#allocation6 + $0x68] sm:$0xff]  ;;  %v4222_v55 = vld [vmem:[#allocation6 + $0x50] sm:$0xff] }
 0x220   : > { %1656 = vmatpush.bf16.msrb.mxu1 %v4239_v45  ;;  %v1315_v3 = vadd.f32 %v1301_v59, %v1293_v60  ;;  %v4226_v45 = vld [vmem:[#allocation6 + $0x70] sm:$0xff] }
 0x222   : > { %v1331_v17 = vmax.f32 %v1315_v3, 0.0  ;;  %v4247_v3 = vld [vmem:[#allocation4 + $0x28] sm:$0xff] }
 0x224   : > { %1657 = vmatpush.bf16.msrb.mxu1 %v4238_v49  ;;  %v1341_v18 = vpack.c.bf16 %v1331_v17, %v1329_v12  ;;  %v4254_v12 = vld [vmem:[#allocation6 + $0x130] sm:$0xff] }
 0x225   : > { %v1277_v51 = vpop.f32.mrf.mxu2 }
 0x226   : > { %v1295_v56 = vadd.f32 %v1277_v51, %v1129_v53 }
 0x228   : > { %v1317_v0 = vadd.f32 %v1301_v59, %v1295_v56 }
 0x22a   : > { %v1333_v5 = vmax.f32 %v1317_v0, 0.0 }
 0x22d   : > { %v1279_v61 = vpop.f32.mrf.mxu2 }
 0x22e   : > { %v1297_v23 = vadd.f32 %v1279_v61, %v1131_v58  ;;  %v4221_v58 = vld [vmem:[#allocation6 + $0x48] sm:$0xff] }
 0x230   : > { %v1319_v21 = vadd.f32 %v1301_v59, %v1297_v23  ;;  %v4220_v59 = vld [vmem:[#allocation6 + $0x40] sm:$0xff] }
 0x232   : > { %v1335_v46 = vmax.f32 %v1319_v21, 0.0 }
 0x234   : > { %v1343_v11 = vpack.c.bf16 %v1335_v46, %v1333_v5 }
 0x236   : > { %1388 = vmatpush.bf16.msra.mxu0 %v1343_v11  ;;  %1483 = vmatpush.bf16.msrb.mxu3 %v1343_v11 }
 0x237   : > { %1847 = vmatpush.bf16.msra.mxu1 %v1343_v11 }
 0x23a   : > { %1389 = vmatpush.bf16.msra.mxu0 %v1341_v18  ;;  %1484 = vmatpush.bf16.msrb.mxu3 %v1341_v18 }
 0x23b   : > { %1848 = vmatpush.bf16.msra.mxu1 %v1341_v18  ;;  %v4252_v18 = vld [vmem:[#allocation6 + $0x120] sm:$0xff] }
 0x23e   : > { %1390 = vmatpush.bf16.msra.mxu0 %v1339_v22  ;;  %1485 = vmatpush.bf16.msrb.mxu3 %v1339_v22 }
 0x23f   : > { %1849 = vmatpush.bf16.msra.mxu1 %v1339_v22  ;;  %v4262_v22 = vld [vmem:[#allocation6 + $0x170] sm:$0xff] }
 0x242   : > { %1391 = vmatpush.bf16.msra.mxu0 %v1337_v28  ;;  %1486 = vmatpush.bf16.msrb.mxu3 %v1337_v28 }
 0x243   : > { %1850 = vmatpush.bf16.msra.mxu1 %v1337_v28  ;;  %v4261_v28 = vld [vmem:[#allocation6 + $0x168] sm:$0xff] }
 0x245   : > { %3528 = vmatmul.msk.bf16.vlgmr.msrb.gmra.mxu3 %vm1358_vm1, %v5193_v41  ;;  %3516 = vmatmul.msk.bf16.vlgmr.msra.gmra.mxu0 %vm1358_vm1, %v5185_v31  ;;  %v4216_v31 = vld [vmem:[#allocation6 + $0x20] sm:$0xff] }
 0x246   : > { %1631 = vmatpush.bf16.msrb.mxu0 %v4237_v27  ;;  %1768 = vmatpush.bf16.msrb.mxu2 %v4216_v31  ;;  %v4230_v41 = vld [vmem:[#allocation6 + $0x80] sm:$0xff]  ;;  %v4249_v27 = vld [vmem:[#allocation6 + $0x108] sm:$0xff] }
 0x247   : > { %1784 = vmatpush.bf16.msra.mxu3 %v4227_v44 }
 0x24a   : > { %1632 = vmatpush.bf16.msrb.mxu0 %v4236_v29  ;;  %1769 = vmatpush.bf16.msrb.mxu2 %v4215_v39  ;;  %v4248_v29 = vld [vmem:[#allocation6 + $0x100] sm:$0xff] }
 0x24b   : > { %1785 = vmatpush.bf16.msra.mxu3 %v4226_v45  ;;  %v4256_v39 = vld [vmem:[#allocation6 + $0x140] sm:$0xff] }
 0x24e   : > { %1633 = vmatpush.bf16.msrb.mxu0 %v4235_v7  ;;  %1770 = vmatpush.bf16.msrb.mxu2 %v4214_v42  ;;  %v4260_v7 = vld [vmem:[#allocation6 + $0x160] sm:$0xff] }
 0x24f   : > { %1786 = vmatpush.bf16.msra.mxu3 %v4225_v48 }
 0x252   : > { %1634 = vmatpush.bf16.msrb.mxu0 %v4234_v30 }
 0x255   : > { %3529 = vmatmul.msk.bf16.gmra.mxu3 %vm1358_vm1, %v5199_v52  ;;  %3517 = vmatmul.msk.bf16.gmra.mxu0 %vm1358_vm1, %v5191_v40  ;;  %v4213_v40 = vld [vmem:[#allocation6 + $0x8] sm:$0xff] }
 0x256   : > { %1635 = vmatpush.bf16.msrb.mxu0 %v4233_v35  ;;  %1771 = vmatpush.bf16.msrb.mxu2 %v4213_v40  ;;  %v4258_v35 = vld [vmem:[#allocation6 + $0x150] sm:$0xff] }
 0x25a   : > { %1636 = vmatpush.bf16.msrb.mxu0 %v4232_v37  ;;  %1772 = vmatpush.bf16.msrb.mxu2 %v4212_v43 }
 0x25e   : > { %1637 = vmatpush.bf16.msrb.mxu0 %v4231_v38  ;;  %1995 = vmatpush.bf16.msra.mxu2 %v4255_v9  ;;  %v4257_v38 = vld [vmem:[#allocation6 + $0x148] sm:$0xff] }
 0x262   : > { %1638 = vmatpush.bf16.msrb.mxu0 %v4230_v41  ;;  %1996 = vmatpush.bf16.msra.mxu2 %v4254_v12 }
 0x266   : > { %1828 = vmatpush.bf16.msra.mxu0 %v5167_v8  ;;  %v4224_v8 = vld [vmem:[#allocation6 + $0x60] sm:$0xff]  ;;  %1997 = vmatpush.bf16.msra.mxu2 %v4253_v15 }
 0x267   : > { %1787 = vmatpush.bf16.msra.mxu3 %v4224_v8 }
 0x26a   : > { %1829 = vmatpush.bf16.msra.mxu0 %v5173_v16  ;;  %v4223_v16 = vld [vmem:[#allocation6 + $0x58] sm:$0xff]  ;;  %1998 = vmatpush.bf16.msra.mxu2 %v4252_v18 }
 0x26b   : > { %1788 = vmatpush.bf16.msra.mxu3 %v4223_v16 }
 0x26e   : > { %1830 = vmatpush.bf16.msra.mxu0 %v5179_v26  ;;  %1999 = vmatpush.bf16.msra.mxu2 %v4251_v20 }
 0x26f   : > { %1789 = vmatpush.bf16.msra.mxu3 %v4222_v55 }
 0x272   : > { %1831 = vmatpush.bf16.msra.mxu0 %v5183_v32  ;;  %2000 = vmatpush.bf16.msra.mxu2 %v4250_v47 }
 0x273   : > { %1790 = vmatpush.bf16.msra.mxu3 %v4221_v58 }
 0x276   : > { %2001 = vmatpush.bf16.msra.mxu2 %v4249_v27  ;;  %v4281_v27 = vld [vmem:[%s5450_s8 + $0x78] sm:$0xff] }
 0x277   : > { %1791 = vmatpush.bf16.msra.mxu3 %v4220_v59 }
 0x27a   : > { %2002 = vmatpush.bf16.msra.mxu2 %v4248_v29 }
 0x27b   : > { %2014 = vmatpush.bf16.msrb.mxu3 %v4263_v13 }
 0x27f   : > { %2015 = vmatpush.bf16.msrb.mxu3 %v4262_v22 }
 0x283   : > { %2016 = vmatpush.bf16.msrb.mxu3 %v4261_v28  ;;  %v4272_v28 = vld [vmem:[%s5450_s8 + $0x38] sm:$0xff] }
 0x284   : > { %v1469_v51 = vpop.f32.mrf.mxu1 }
 0x287   : > { %2017 = vmatpush.bf16.msrb.mxu3 %v4260_v7 }
 0x28a   : > { %v1374_v49 = vpop.f32.mrf.mxu3 }
 0x28b   : > { %2018 = vmatpush.bf16.msrb.mxu3 %v4259_v34 }
 0x28c   : > { %v1471_v52 = vpop.f32.mrf.mxu1 }
 0x28d   : > { %v1498_v53 = vpack.c.bf16 %v1471_v52, %v1469_v51 }
 0x28f   : > { %1639 = vmatmul.bf16.vlgmr.msrb.gmra.mxu0 %v1498_v53  ;;  %2019 = vmatpush.bf16.msrb.mxu3 %v4258_v35 }
 0x292   : > { %v1376_v50 = vpop.f32.mrf.mxu3 }
 0x293   : > { %v1403_v26 = vpack.c.bf16 %v1376_v50, %v1374_v49  ;;  %2020 = vmatpush.bf16.msrb.mxu3 %v4257_v38 }
 0x294   : > { %v1474_v57 = vpop.f32.mrf.mxu1 }
 0x295   : > { %1773 = vmatmul.bf16.vlgmr.msrb.gmra.mxu2 %v1403_v26 }
 0x296   : > { %2184 = vmatpush.bf16.msrb.mxu2 %v4281_v27 }
 0x297   : > { %2021 = vmatpush.bf16.msrb.mxu3 %v4256_v39  ;;  %v4278_v39 = vld [vmem:[%s5450_s8 + $0x60] sm:$0xff] }
 0x29a   : > { %v1379_v32 = vpop.f32.mrf.mxu3 }
 0x29c   : > { %v1476_v60 = vpop.f32.mrf.mxu1 }
 0x29d   : > { %v1500_v61 = vpack.c.bf16 %v1476_v60, %v1474_v57 }
 0x29f   : > { %1644 = vmatmul.bf16.gmra.mxu0 %v1500_v61 }
 0x2a2   : > { %v1381_v54 = vpop.f32.mrf.mxu3 }
 0x2a3   : > { %v1405_v56 = vpack.c.bf16 %v1381_v54, %v1379_v32 }
 0x2a5   : > { %1778 = vmatmul.bf16.gmra.mxu2 %v1405_v56 }
 0x2af   : > { %3666 = vmatmul.msk.bf16.vlgmr.msra.gmra.mxu0 %vm1358_vm1, %v4246_v63 }
 0x2bf   : > { %3667 = vmatmul.msk.bf16.gmra.mxu0 %vm1358_vm1, %v4247_v3 }
 0x2c2   : > { %v1393_v62 = vpop.f32.mrf.mxu0 }
 0x2c8   : > { %v1488_v0 = vpop.f32.mrf.mxu3 }
 0x2ca   : > { %v1395_v23 = vpop.f32.mrf.mxu0 }
 0x2cb   : > { %v1404_v1 = vpack.c.bf16 %v1395_v23, %v1393_v62 }
 0x2cd   : > { %1792 = vmatmul.bf16.vlgmr.msra.gmra.mxu3 %v1404_v1 }
 0x2ce   : > { %2246 = vmatpush.bf16.msra.mxu3 %v4272_v28  ;;  %v4303_v28 = vld [vmem:[%s5453_s11 + $0x60] sm:$0xff] }
 0x2d0   : > { %v1490_v2 = vpop.f32.mrf.mxu3 }
 0x2d1   : > { %v1499_v21 = vpack.c.bf16 %v1490_v2, %v1488_v0 }
 0x2d2   : > { %v1398_v19 = vpop.f32.mrf.mxu0 }
 0x2d3   : > { %1658 = vmatmul.bf16.vlgmr.msrb.gmra.mxu1 %v1499_v21 }
 0x2d8   : > { %v1493_v4 = vpop.f32.mrf.mxu3 }
 0x2da   : > { %v1400_v25 = vpop.f32.mrf.mxu0 }
 0x2db   : > { %v1406_v5 = vpack.c.bf16 %v1400_v25, %v1398_v19 }
 0x2dd   : > { %1797 = vmatmul.bf16.gmra.mxu3 %v1406_v5 }
 0x2e0   : > { %v1495_v46 = vpop.f32.mrf.mxu3 }
 0x2e1   : > { %v1501_v6 = vpack.c.bf16 %v1495_v46, %v1493_v4 }
 0x2e3   : > { %1663 = vmatmul.bf16.gmra.mxu1 %v1501_v6 }
 0x2f3   : > { %3668 = vmatmul.msk.bf16.vlgmr.msra.gmra.mxu1 %vm1358_vm1, %v4246_v63 }
 0x303   : > { %3669 = vmatmul.msk.bf16.gmra.mxu1 %vm1358_vm1, %v4247_v3  ;;  %v4474_v3 = vld [vmem:[#allocation7] ss:$0 sm:$0xff] }
 0x30c   : > { %v1640_v17 = vpop.f32.mrf.mxu0 }
 0x314   : > { %v1642_v11 = vpop.f32.mrf.mxu0 }
 0x318   : > { %v1774_v52 = vpop.f32.mrf.mxu2 }
 0x31c   : > { %v1645_v14 = vpop.f32.mrf.mxu0 }
 0x320   : > { %v1776_v54 = vpop.f32.mrf.mxu2 }
 0x324   : > { %v1647_v10 = vpop.f32.mrf.mxu0 }
 0x328   : > { %v1779_v56 = vpop.f32.mrf.mxu2 }
 0x32c   : > { %v1833_v24 = vpop.f32.mrf.mxu0 }
 0x330   : > { %v1781_v58 = vpop.f32.mrf.mxu2 }
 0x334   : > { %v1835_v30 = vpop.f32.mrf.mxu0 }
 0x335   : > { %v1862_v33 = vpack.c.bf16 %v1835_v30, %v1833_v24  ;;  %v4280_v30 = vld [vmem:[%s5450_s8 + $0x70] sm:$0xff] }
 0x336   : > { %2185 = vmatpush.bf16.msrb.mxu2 %v4280_v30  ;;  %v4297_v30 = vld [vmem:[%s5453_s11 + $0x30] sm:$0xff] }
 0x337   : > { %2003 = vmatmul.bf16.vlgmr.msra.gmra.mxu2 %v1862_v33  ;;  %v4271_v33 = vld [vmem:[%s5450_s8 + $0x30] sm:$0xff] }
 0x338   : > { %2247 = vmatpush.bf16.msra.mxu3 %v4271_v33  ;;  %v4302_v33 = vld [vmem:[%s5453_s11 + $0x58] sm:$0xff] }
 0x33c   : > { %v1838_v31 = vpop.f32.mrf.mxu0 }
 0x344   : > { %v1840_v40 = vpop.f32.mrf.mxu0 }
 0x345   : > { %v1864_v43 = vpack.c.bf16 %v1840_v40, %v1838_v31  ;;  %v4270_v31 = vld [vmem:[%s5450_s8 + $0x28] sm:$0xff]  ;;  %v4264_v40 = vld [vmem:[#allocation9] sm:$0xff] }
 0x346   : > { %2248 = vmatpush.bf16.msra.mxu3 %v4270_v31  ;;  %v3960_v31 = vld [vmem:[%s5452_s10 + $0x8] sm:$0xf] }
 0x347   : > { %2008 = vmatmul.bf16.gmra.mxu2 %v1864_v43  ;;  %v4273_v43 = vld [vmem:[#allocation9 + $0x8] sm:$0xff] }
 0x350   : > { %v1659_v36 = vpop.f32.mrf.mxu1  ;;  %v1793_v53 = vpop.f32.mrf.mxu3 }
 0x351   : > { %v1660_v37 = vadd.f32 %v1659_v36, %v1640_v17 }
 0x353   : > { %v1775_v62 = vadd.f32 %v1774_v52, %v1660_v37  ;;  %v4279_v37 = vld [vmem:[%s5450_s8 + $0x68] sm:$0xff]  ;;  %v4265_v52 = vld [vmem:[%s5450_s8] sm:$0xff] }
 0x354   : > { %2186 = vmatpush.bf16.msrb.mxu2 %v4279_v37  ;;  %v4294_v37 = vld [vmem:[%s5453_s11 + $0x18] sm:$0xff] }
 0x355   : > { %v1794_v23 = vadd.f32 %v1793_v53, %v1775_v62  ;;  %v4287_v53 = vld [vmem:[%s5450_s8 + $0xa0] sm:$0xff] }
 0x358   : > { %v1661_v41 = vpop.f32.mrf.mxu1  ;;  %v1795_v55 = vpop.f32.mrf.mxu3  ;;  %2187 = vmatpush.bf16.msrb.mxu2 %v4278_v39  ;;  %v4300_v39 = vld [vmem:[%s5453_s11 + $0x48] sm:$0xff] }
 0x359   : > { %v1662_v42 = vadd.f32 %v1661_v41, %v1642_v11  ;;  %v4269_v41 = vld [vmem:[%s5450_s8 + $0x20] sm:$0xff] }
 0x35a   : > { %2249 = vmatpush.bf16.msra.mxu3 %v4269_v41  ;;  %v4292_v41 = vld [vmem:[%s5453_s11 + $0x8] sm:$0xff] }
 0x35b   : > { %v1777_v1 = vadd.f32 %v1776_v54, %v1662_v42  ;;  %v4290_v42 = vld [vmem:[%s5450_s8 + $0xb8] sm:$0xff] }
 0x35c   : > { %v4286_v54 = vld [vmem:[%s5450_s8 + $0x98] sm:$0xff] }
 0x35d   : > { %v1796_v19 = vadd.f32 %v1795_v55, %v1777_v1  ;;  %v4285_v55 = vld [vmem:[%s5450_s8 + $0x90] sm:$0xff] }
 0x360   : > { %v1664_v44 = vpop.f32.mrf.mxu1  ;;  %v1798_v57 = vpop.f32.mrf.mxu3 }
 0x361   : > { %v1665_v45 = vadd.f32 %v1664_v44, %v1645_v14  ;;  %v4277_v44 = vld [vmem:[%s5450_s8 + $0x58] sm:$0xff] }
 0x362   : > { %2188 = vmatpush.bf16.msrb.mxu2 %v4277_v44  ;;  %v4310_v44 = vld [vmem:[%s5453_s11 + $0x98] sm:$0xff] }
 0x363   : > { %v1780_v14 = vadd.f32 %v1779_v56, %v1665_v45  ;;  %v4268_v45 = vld [vmem:[%s5450_s8 + $0x18] sm:$0xff]  ;;  %v4284_v56 = vld [vmem:[%s5450_s8 + $0x88] sm:$0xff] }
 0x364   : > { %2250 = vmatpush.bf16.msra.mxu3 %v4268_v45  ;;  %v4309_v45 = vld [vmem:[%s5453_s11 + $0x90] sm:$0xff] }
 0x368   : > { %v1666_v48 = vpop.f32.mrf.mxu1  ;;  %v1800_v59 = vpop.f32.mrf.mxu3 }
 0x369   : > { %v1667_v49 = vadd.f32 %v1666_v48, %v1647_v10  ;;  %v1799_v10 = vadd.f32 %v1798_v57, %v1780_v14  ;;  %v4282_v48 = vld [vmem:[#allocation9 + $0x10] sm:$0xff] }
 0x36a   : > { %v4283_v57 = vld [vmem:[%s5450_s8 + $0x80] sm:$0xff] }
 0x36b   : > { %v1782_v18 = vadd.f32 %v1781_v58, %v1667_v49  ;;  %v4276_v49 = vld [vmem:[%s5450_s8 + $0x50] sm:$0xff] }
 0x36c   : > { %2189 = vmatpush.bf16.msrb.mxu2 %v4276_v49  ;;  %v4307_v49 = vld [vmem:[%s5453_s11 + $0x80] sm:$0xff] }
 0x36d   : > { %v1801_v22 = vadd.f32 %v1800_v59, %v1782_v18  ;;  %v4304_v18 = vld [vmem:[%s5453_s11 + $0x68] sm:$0xff] }
 0x370   : > { %v1852_v8 = vpop.f32.mrf.mxu1 }
 0x378   : > { %v1854_v16 = vpop.f32.mrf.mxu1 }
 0x379   : > { %v1863_v50 = vpack.c.bf16 %v1854_v16, %v1852_v8  ;;  %v4267_v8 = vld [vmem:[%s5450_s8 + $0x10] sm:$0xff] }
 0x37a   : > { %v4289_v16 = vld [vmem:[%s5450_s8 + $0xb0] sm:$0xff]  ;;  %2251 = vmatpush.bf16.msra.mxu3 %v4267_v8 }
 0x37b   : > { %2022 = vmatmul.bf16.vlgmr.msrb.gmra.mxu3 %v1863_v50  ;;  %v4275_v50 = vld [vmem:[%s5450_s8 + $0x48] sm:$0xff] }
 0x37c   : > { %2190 = vmatpush.bf16.msrb.mxu2 %v4275_v50 }
 0x380   : > { %v1857_v26 = vpop.f32.mrf.mxu1 }
 0x388   : > { %v1859_v51 = vpop.f32.mrf.mxu1 }
 0x389   : > { %v1865_v32 = vpack.c.bf16 %v1859_v51, %v1857_v26  ;;  %v4266_v26 = vld [vmem:[%s5450_s8 + $0x8] sm:$0xff] }
 0x38a   : > { %v4288_v51 = vld [vmem:[%s5450_s8 + $0xa8] sm:$0xff]  ;;  %2252 = vmatpush.bf16.msra.mxu3 %v4266_v26 }
 0x38b   : > { %2027 = vmatmul.bf16.gmra.mxu3 %v1865_v32  ;;  %v4274_v32 = vld [vmem:[%s5450_s8 + $0x40] sm:$0xff] }
 0x38c   : > { %2191 = vmatpush.bf16.msrb.mxu2 %v4274_v32 }
 0x38e   : > { %2253 = vmatpush.bf16.msra.mxu3 %v4265_v52 }
 0x3ba   : > { %v2004_v60 = vpop.f32.mrf.mxu2 }
 0x3c2   : > { %v2006_v0 = vpop.f32.mrf.mxu2 }
 0x3ca   : > { %v2009_v6 = vpop.f32.mrf.mxu2 }
 0x3d2   : > { %v2011_v13 = vpop.f32.mrf.mxu2 }
 0x3fe   : > { %v2023_v61 = vpop.f32.mrf.mxu3 }
 0x3ff   : > { %v2024_v63 = vadd.f32 %v2023_v61, %v2004_v60 }
 0x401   : > { %v2033_v2 = vadd.f32 %v2024_v63, %v1794_v23 }
 0x403   : > { %v2041_v25 = vadd.f32 %v4474_v3, %v2033_v2 }
 0x405   : > { %v2045_v9 = vmax.f32 %v2041_v25, 0.0 }
 0x406   : > { %v2025_v21 = vpop.f32.mrf.mxu3 }
 0x407   : > { %v2026_v4 = vadd.f32 %v2025_v21, %v2006_v0 }
 0x409   : > { %v2034_v5 = vadd.f32 %v2026_v4, %v1796_v19 }
 0x40b   : > { %v2042_v46 = vadd.f32 %v4474_v3, %v2034_v5  ;;  %v4306_v5 = vld [vmem:[%s5453_s11 + $0x78] sm:$0xff] }
 0x40d   : > { %v2046_v17 = vmax.f32 %v2042_v46, 0.0 }
 0x40e   : > { %v2028_v11 = vpop.f32.mrf.mxu3 }
 0x40f   : > { %v2049_v12 = vpack.c.bf16 %v2046_v17, %v2045_v9  ;;  %v2029_v15 = vadd.f32 %v2028_v11, %v2009_v6  ;;  %v4475_v6 = vld [vmem:[#allocation10] ss:$0 sm:$0xff]  ;;  %v4305_v9 = vld [vmem:[%s5453_s11 + $0x70] sm:$0xff]  ;;  %v4314_v17 = vld [vmem:[%s5453_s11 + $0xb8] sm:$0xff] }
 0x411   : > { %v2035_v20 = vadd.f32 %v2029_v15, %v1799_v10 }
 0x413   : > { %v2043_v29 = vadd.f32 %v4474_v3, %v2035_v20 }
 0x415   : > { %v2047_v35 = vmax.f32 %v2043_v29, 0.0  ;;  %v3878_v29 = vld [vmem:[%s5452_s10 + $0x4] sm:$0xf] }
 0x416   : > { %v2030_v47 = vpop.f32.mrf.mxu3 }
 0x417   : > { %v2031_v24 = vadd.f32 %v2030_v47, %v2011_v13  ;;  %v4312_v13 = vld [vmem:[%s5453_s11 + $0xa8] sm:$0xff] }
 0x419   : > { %v2036_v7 = vadd.f32 %v2031_v24, %v1801_v22  ;;  %v4298_v24 = vld [vmem:[%s5453_s11 + $0x38] sm:$0xff] }
 0x41b   : > { %v2044_v34 = vadd.f32 %v4474_v3, %v2036_v7  ;;  %v2376_v7 = vld [vmem:[%s5452_s10] sm:$0xf] }
 0x41d   : > { %v2048_v36 = vmax.f32 %v2044_v34, 0.0  ;;  %v4296_v34 = vld [vmem:[%s5453_s11 + $0x28] sm:$0xff] }
 0x41f   : > { %v2050_v38 = vpack.c.bf16 %v2048_v36, %v2047_v35  ;;  %v4301_v35 = vld [vmem:[%s5453_s11 + $0x50] sm:$0xff]  ;;  %v4295_v36 = vld [vmem:[%s5453_s11 + $0x20] sm:$0xff] }
 0x421   : > { %2068 = vmatpush.bf16.msrb.mxu0 %v2050_v38  ;;  %2110 = vmatpush.bf16.msrb.mxu1 %v2050_v38 }
 0x425   : > { %2069 = vmatpush.bf16.msrb.mxu0 %v2049_v12  ;;  %2111 = vmatpush.bf16.msrb.mxu1 %v2049_v12 }
 0x428   : > { %3738 = vmatmul.msk.bf16.vlgmr.msrb.gmra.mxu0 %vm2058_vm2, %v4264_v40  ;;  %3743 = vmatmul.msk.bf16.vlgmr.msrb.gmra.mxu1 %vm2058_vm2, %v4273_v43  ;;  %v4299_v40 = vld [vmem:[%s5453_s11 + $0x40] sm:$0xff] }
 0x429   : > { %2277 = vmatpush.bf16.msra.mxu0 %v2050_v38  ;;  %2351 = vmatpush.bf16.msra.mxu1 %v4290_v42  ;;  %v4293_v38 = vld [vmem:[%s5453_s11 + $0x10] sm:$0xff]  ;;  %v4311_v42 = vld [vmem:[%s5453_s11 + $0xa0] sm:$0xff] }
 0x42a   : > { %v4291_v43 = vld [vmem:[%s5453_s11] sm:$0xff] }
 0x42d   : > { %2278 = vmatpush.bf16.msra.mxu0 %v2049_v12  ;;  %2352 = vmatpush.bf16.msra.mxu1 %v4289_v16  ;;  %v4313_v12 = vld [vmem:[%s5453_s11 + $0xb0] sm:$0xff] }
 0x431   : > { %2353 = vmatpush.bf16.msra.mxu1 %v4288_v51  ;;  %2494 = vmatpush.bf16.msrb.mxu0 %v4306_v5  ;;  %v2673_v5 = vld [vmem:[#allocation13] sm:$0x3] }
 0x435   : > { %2354 = vmatpush.bf16.msra.mxu1 %v4287_v53  ;;  %2495 = vmatpush.bf16.msrb.mxu0 %v4305_v9  ;;  %v4319_v9 = vld [vmem:[%s5456_s14 + $0x20] sm:$0xff] }
 0x438   : > { %3828 = vmatmul.msk.bf16.vlgmr.msra.gmra.mxu0 %vm2058_vm2, %v4282_v48  ;;  %v4308_v48 = vld [vmem:[%s5453_s11 + $0x88] sm:$0xff] }
 0x439   : > { %2355 = vmatpush.bf16.msra.mxu1 %v4286_v54  ;;  %2496 = vmatpush.bf16.msrb.mxu0 %v4304_v18 }
 0x43d   : > { %2356 = vmatpush.bf16.msra.mxu1 %v4285_v55  ;;  %2497 = vmatpush.bf16.msrb.mxu0 %v4303_v28 }
 0x441   : > { %2357 = vmatpush.bf16.msra.mxu1 %v4284_v56  ;;  %2498 = vmatpush.bf16.msrb.mxu0 %v4302_v33  ;;  %v4334_v33 = vld [vmem:[#allocation16 + $0x38] sm:$0xff] }
 0x445   : > { %2358 = vmatpush.bf16.msra.mxu1 %v4283_v57  ;;  %2499 = vmatpush.bf16.msrb.mxu0 %v4301_v35  ;;  %v4342_v35 = vld [vmem:[#allocation16 + $0x78] sm:$0xff] }
 0x449   : > { %2652 = vmatpush.bf16.msrb.mxu1 %v4314_v17  ;;  %2500 = vmatpush.bf16.msrb.mxu0 %v4300_v39  ;;  %v4316_v17 = vld [vmem:[%s5456_s14 + $0x8] sm:$0xff] }
 0x44a   : > { %v4341_v39 = vld [vmem:[#allocation16 + $0x70] sm:$0xff] }
 0x44d   : > { %2653 = vmatpush.bf16.msrb.mxu1 %v4313_v12  ;;  %2501 = vmatpush.bf16.msrb.mxu0 %v4299_v40  ;;  %v4325_v12 = vld [vmem:[%s5456_s14 + $0x50] sm:$0xff]  ;;  %v4332_v40 = vld [vmem:[#allocation16 + $0x28] sm:$0xff] }
 0x451   : > { %2654 = vmatpush.bf16.msrb.mxu1 %v4312_v13 }
 0x455   : > { %2655 = vmatpush.bf16.msrb.mxu1 %v4311_v42 }
 0x459   : > { %2656 = vmatpush.bf16.msrb.mxu1 %v4310_v44 }
 0x45d   : > { %2657 = vmatpush.bf16.msrb.mxu1 %v4309_v45 }
 0x461   : > { %2658 = vmatpush.bf16.msrb.mxu1 %v4308_v48  ;;  %v4350_v48 = vld [vmem:[#allocation16 + $0xb8] sm:$0xff] }
 0x465   : > { %2659 = vmatpush.bf16.msrb.mxu1 %v4307_v49 }
 0x4a5   : > { %v2071_v58 = vpop.f32.mrf.mxu0  ;;  %v2113_v59 = vpop.f32.mrf.mxu1 }
 0x4ad   : > { %v2073_v60 = vpop.f32.mrf.mxu0  ;;  %v2115_v61 = vpop.f32.mrf.mxu1 }
 0x4ae   : > { %v2076_v62 = vpack.c.bf16 %v2073_v60, %v2071_v58  ;;  %v2118_v63 = vpack.c.bf16 %v2115_v61, %v2113_v59  ;;  %v4322_v58 = vld [vmem:[%s5456_s14 + $0x38] sm:$0xff]  ;;  %v4476_v61 = vld [vmem:[#allocation12] ss:$0 sm:$0xff] }
 0x4b0   : > { %2192 = vmatmul.bf16.vlgmr.msrb.gmra.mxu2 %v2118_v63  ;;  %2254 = vmatmul.bf16.vlgmr.msra.gmra.mxu3 %v2076_v62  ;;  %v4321_v62 = vld [vmem:[%s5456_s14 + $0x30] sm:$0xff] }
 0x4b5   : > { %v2280_v0 = vpop.f32.mrf.mxu0 }
 0x4bd   : > { %v2282_v23 = vpop.f32.mrf.mxu0 }
 0x4be   : > { %v2285_v1 = vpack.c.bf16 %v2282_v23, %v2280_v0 }
 0x4c0   : > { %2359 = vmatmul.bf16.vlgmr.msra.gmra.mxu1 %v2285_v1  ;;  %v4320_v1 = vld [vmem:[%s5456_s14 + $0x28] sm:$0xff] }
 0x533   : > { %v2193_v2 = vpop.f32.mrf.mxu2  ;;  %v2255_v3 = vpop.f32.mrf.mxu3 }
 0x534   : > { %v2256_v19 = vadd.f32 %v2255_v3, %v2193_v2 }
 0x53b   : > { %v2195_v4 = vpop.f32.mrf.mxu2  ;;  %v2257_v25 = vpop.f32.mrf.mxu3 }
 0x53c   : > { %v2258_v11 = vadd.f32 %v2257_v25, %v2195_v4  ;;  %v2705_v25 = vld [vmem:[#allocation13 + $0x2] sm:$0x3] }
 0x53d   : > { %v2360_v21 = vpop.f32.mrf.mxu1 }
 0x53e   : > { %v2365_v46 = vadd.f32 %v2360_v21, %v2256_v19  ;;  %v4318_v21 = vld [vmem:[%s5456_s14 + $0x18] sm:$0xff] }
 0x540   : > { %v2371_v15 = vadd.f32 %v4475_v6, %v2365_v46  ;;  %v2813_v46 = vld [vmem:[#allocation13 + $0x4] sm:$0x3] }
 0x542   : > { %v2373_v47 = vmax.f32 %v2371_v15, 0.0  ;;  %v4324_v15 = vld [vmem:[%s5456_s14 + $0x48] sm:$0xff] }
 0x545   : > { %v2362_v14 = vpop.f32.mrf.mxu1 }
 0x546   : > { %v2366_v10 = vadd.f32 %v2362_v14, %v2258_v11  ;;  %v4326_v11 = vld [vmem:[%s5456_s14 + $0x58] sm:$0xff]  ;;  %v4315_v14 = vld [vmem:[%s5456_s14] sm:$0xff] }
 0x547   : > { %2871 = vmatpush.bf16.msra.mxu1 %v4326_v11 }
 0x548   : > { %v2372_v20 = vadd.f32 %v4475_v6, %v2366_v10  ;;  %v4317_v6 = vld [vmem:[%s5456_s14 + $0x10] sm:$0xff]  ;;  %v4323_v10 = vld [vmem:[%s5456_s14 + $0x40] sm:$0xff] }
 0x54a   : > { %v2374_v22 = vmax.f32 %v2372_v20, 0.0 }
 0x54b   : > { %2872 = vmatpush.bf16.msra.mxu1 %v4325_v12 }
 0x54c   : > { %v2375_v27 = vpack.c.bf16 %v2374_v22, %v2373_v47 }
 0x54e   : > { %2387 = vmatpush.bf16.msra.mxu2 %v2375_v27  ;;  %2422 = vmatpush.bf16.msrb.mxu3 %v2375_v27 }
 0x54f   : > { %2873 = vmatpush.bf16.msra.mxu1 %v4324_v15 }
 0x551   : > { %3879 = vmatmul.msk.bf16.vlgmr.msrb.gmra.mxu3 %vm982_vm0, %v3878_v29  ;;  %3877 = vmatmul.msk.bf16.vlgmr.msra.gmra.mxu2 %vm982_vm0, %v2376_v7 }
 0x552   : > { %2580 = vmatpush.bf16.msra.mxu3 %v2375_v27  ;;  %2555 = vmatpush.bf16.msrb.mxu2 %v4298_v24 }
 0x553   : > { %2874 = vmatpush.bf16.msra.mxu1 %v4323_v10  ;;  %v4478_v10 = vld [vmem:[#allocation18] ss:$0 sm:$0xff] }
 0x556   : > { %2556 = vmatpush.bf16.msrb.mxu2 %v4297_v30 }
 0x55a   : > { %2557 = vmatpush.bf16.msrb.mxu2 %v4296_v34 }
 0x55e   : > { %2558 = vmatpush.bf16.msrb.mxu2 %v4295_v36 }
 0x561   : > { %3961 = vmatmul.msk.bf16.vlgmr.msra.gmra.mxu3 %vm982_vm0, %v3960_v31  ;;  %v4333_v31 = vld [vmem:[#allocation16 + $0x30] sm:$0xff] }
 0x562   : > { %2559 = vmatpush.bf16.msrb.mxu2 %v4294_v37  ;;  %v4477_v37 = vld [vmem:[#allocation15] ss:$0 sm:$0xff] }
 0x566   : > { %2560 = vmatpush.bf16.msrb.mxu2 %v4293_v38 }
 0x56a   : > { %2561 = vmatpush.bf16.msrb.mxu2 %v4292_v41 }
 0x56e   : > { %2562 = vmatpush.bf16.msrb.mxu2 %v4291_v43 }
 0x572   : > { %2763 = vmatpush.bf16.msra.mxu2 %v4322_v58  ;;  %v4337_v58 = vld [vmem:[#allocation16 + $0x50] sm:$0xff] }
 0x576   : > { %2764 = vmatpush.bf16.msra.mxu2 %v4321_v62  ;;  %v4327_v62 = vld [vmem:[#allocation16] sm:$0xff] }
 0x57a   : > { %2765 = vmatpush.bf16.msra.mxu2 %v4320_v1  ;;  %v4344_v1 = vld [vmem:[#allocation16 + $0x88] sm:$0xff] }
 0x57e   : > { %2766 = vmatpush.bf16.msra.mxu2 %v4319_v9 }
 0x5d4   : > { %v2424_v8 = vpop.f32.mrf.mxu3  ;;  %v2389_v16 = vpop.f32.mrf.mxu2 }
 0x5d5   : > { %v2428_v50 = vpack.c.bf16 %v2424_v8, %v2424_v8  ;;  %v2393_v26 = vpack.c.bf16 %v2389_v16, %v2389_v16  ;;  %v4331_v8 = vld [vmem:[#allocation16 + $0x20] sm:$0xff] }
 0x5d7   : > { %2502 = vmatmul.bf16.vlgmr.msrb.gmra.mxu0 %v2428_v50  ;;  %2563 = vmatmul.bf16.vlgmr.msrb.gmra.mxu2 %v2393_v26  ;;  %v2888_v50 = vld [vmem:[%s5458_s16] sm:$0x1]  ;;  %v4081_v26 = vld [vmem:[%s5458_s16 + $0x1] sm:$0x1] }
 0x5dc   : > { %v2426_v51 = vpop.f32.mrf.mxu3  ;;  %v2391_v32 = vpop.f32.mrf.mxu2 }
 0x5dd   : > { %v4349_v51 = vld [vmem:[#allocation16 + $0xb0] sm:$0xff]  ;;  %v4348_v32 = vld [vmem:[#allocation16 + $0xa8] sm:$0xff] }
 0x5e4   : > { %v2582_v52 = vpop.f32.mrf.mxu3 }
 0x5e5   : > { %v2586_v53 = vpack.c.bf16 %v2582_v52, %v2582_v52  ;;  %v4147_v52 = vld [vmem:[%s5458_s16 + $0x2] sm:$0x1] }
 0x5e7   : > { %2660 = vmatmul.bf16.vlgmr.msrb.gmra.mxu1 %v2586_v53  ;;  %v4340_v53 = vld [vmem:[#allocation16 + $0x68] sm:$0xff] }
 0x5e8   : > { %3072 = vmatpush.bf16.msrb.mxu1 %v4334_v33 }
 0x5ec   : > { %v2584_v54 = vpop.f32.mrf.mxu3  ;;  %3073 = vmatpush.bf16.msrb.mxu1 %v4333_v31 }
 0x5ed   : > { %v4339_v54 = vld [vmem:[#allocation16 + $0x60] sm:$0xff] }
 0x5f0   : > { %3074 = vmatpush.bf16.msrb.mxu1 %v4332_v40 }
 0x5f4   : > { %3075 = vmatpush.bf16.msrb.mxu1 %v4331_v8 }
 0x654   : > { %v2503_v55 = vpop.f32.mrf.mxu0 }
 0x65a   : > { %v2564_v56 = vpop.f32.mrf.mxu2 }
 0x65b   : > { %v2565_v60 = vadd.f32 %v2564_v56, %v2503_v55  ;;  %v4330_v55 = vld [vmem:[#allocation16 + $0x18] sm:$0xff] }
 0x65c   : > { %v2505_v57 = vpop.f32.mrf.mxu0  ;;  %v4338_v56 = vld [vmem:[#allocation16 + $0x58] sm:$0xff]  ;;  %3076 = vmatpush.bf16.msrb.mxu1 %v4330_v55 }
 0x65d   : > { %v4329_v57 = vld [vmem:[#allocation16 + $0x10] sm:$0xff] }
 0x660   : > { %3077 = vmatpush.bf16.msrb.mxu1 %v4329_v57 }
 0x662   : > { %v2566_v59 = vpop.f32.mrf.mxu2 }
 0x663   : > { %v4328_v59 = vld [vmem:[#allocation16 + $0x8] sm:$0xff] }
 0x664   : > { %v2661_v63 = vpop.f32.mrf.mxu1  ;;  %3078 = vmatpush.bf16.msrb.mxu1 %v4328_v59 }
 0x665   : > { %v2665_v0 = vadd.f32 %v2661_v63, %v2565_v60  ;;  %v4336_v60 = vld [vmem:[#allocation16 + $0x48] sm:$0xff]  ;;  %v4335_v63 = vld [vmem:[#allocation16 + $0x40] sm:$0xff] }
 0x667   : > { %v2670_v23 = vadd.f32 %v4476_v61, %v2665_v0  ;;  %v4347_v61 = vld [vmem:[#allocation16 + $0xa0] sm:$0xff]  ;;  %v4346_v0 = vld [vmem:[#allocation16 + $0x98] sm:$0xff] }
 0x668   : > { %3079 = vmatpush.bf16.msrb.mxu1 %v4327_v62 }
 0x669   : > { %v2671_v2 = vmax.f32 %v2670_v23, 0.0  ;;  %v4345_v23 = vld [vmem:[#allocation16 + $0x90] sm:$0xff] }
 0x66b   : > { %v2672_v3 = vpack.c.bf16 %v2671_v2, %v2671_v2  ;;  %v4343_v2 = vld [vmem:[#allocation16 + $0x80] sm:$0xff] }
 0x66c   : > { %v2663_v19 = vpop.f32.mrf.mxu1 }
 0x66d   : > { %v2680_v4 = vsel %vm2678_vm3, %v2672_v3, 0 }
 0x66e   : > { %2689 = vmatpush.bf16.msrb.mxu3 %v2680_v4  ;;  %2716 = vmatpush.bf16.msra.mxu0 %v2680_v4 }
 0x671   : > { %4011 = vmatmul.msk.bf16.vlgmr.msra.gmra.mxu0 %vm2674_vm4, %v2705_v25  ;;  %4010 = vmatmul.msk.bf16.vlgmr.msrb.gmra.mxu3 %vm2674_vm4, %v2673_v5 }
 0x672   : > { %2824 = vmatpush.bf16.msrb.mxu0 %v2680_v4  ;;  %2803 = vmatpush.bf16.msra.mxu3 %v4318_v21 }
 0x676   : > { %2804 = vmatpush.bf16.msra.mxu3 %v4317_v6  ;;  %3011 = vmatpush.bf16.msra.mxu0 %v4342_v35 }
 0x67a   : > { %2805 = vmatpush.bf16.msra.mxu3 %v4316_v17  ;;  %3012 = vmatpush.bf16.msra.mxu0 %v4341_v39 }
 0x67e   : > { %2806 = vmatpush.bf16.msra.mxu3 %v4315_v14  ;;  %3013 = vmatpush.bf16.msra.mxu0 %v4340_v53 }
 0x681   : > { %4054 = vmatmul.msk.bf16.vlgmr.msrb.gmra.mxu0 %vm2674_vm4, %v2813_v46 }
 0x682   : > { %3014 = vmatpush.bf16.msra.mxu0 %v4339_v54 }
 0x686   : > { %3015 = vmatpush.bf16.msra.mxu0 %v4338_v56 }
 0x68a   : > { %3016 = vmatpush.bf16.msra.mxu0 %v4337_v58 }
 0x68e   : > { %3017 = vmatpush.bf16.msra.mxu0 %v4336_v60 }
 0x692   : > { %3018 = vmatpush.bf16.msra.mxu0 %v4335_v63 }
 0x6ee   : > { %v2718_v18 = vpop.f32.mrf.mxu0 }
 0x6ef   : > { %v2722_v20 = vpack.c.bf16 %v2718_v18, %v2718_v18 }
 0x6f1   : > { %4036 = vmatmul.msk.bf16.vlgmr.msra.gmra.mxu2 %vm1358_vm1, %v2722_v20 }
 0x6f4   : > { %v2691_v13 = vpop.f32.mrf.mxu3 }
 0x6f5   : > { %v2695_v47 = vpack.c.bf16 %v2691_v13, %v2691_v13 }
 0x6f6   : > { %v2720_v22 = vpop.f32.mrf.mxu0 }
 0x6f7   : > { %4053 = vmatmul.msk.bf16.vlgmr.msra.gmra.mxu3 %vm1358_vm1, %v2695_v47 }
 0x6fc   : > { %v2693_v24 = vpop.f32.mrf.mxu3 }
 0x6fe   : > { %v2826_v27 = vpop.f32.mrf.mxu0 }
 0x6ff   : > { %v2830_v28 = vpack.c.bf16 %v2826_v27, %v2826_v27 }
 0x701   : > { %4079 = vmatmul.msk.bf16.vlgmr.msra.gmra.mxu1 %vm1358_vm1, %v2830_v28 }
 0x706   : > { %v2828_v29 = vpop.f32.mrf.mxu0 }
 0x774   : > { %v2768_v7 = vpop.f32.mrf.mxu2 }
 0x77a   : > { %v2808_v30 = vpop.f32.mrf.mxu3 }
 0x77b   : > { %v2809_v36 = vadd.f32 %v2808_v30, %v2768_v7 }
 0x77c   : > { %v2770_v34 = vpop.f32.mrf.mxu2 }
 0x77e   : > { %v2876_v38 = vpop.f32.mrf.mxu1 }
 0x77f   : > { %v2880_v41 = vadd.f32 %v2876_v38, %v2809_v36 }
 0x781   : > { %v2885_v42 = vadd.f32 %v4477_v37, %v2880_v41 }
 0x782   : > { %v2810_v43 = vpop.f32.mrf.mxu3 }
 0x783   : > { %v2886_v44 = vmax.f32 %v2885_v42, 0.0 }
 0x785   : > { %v2887_v45 = vpack.c.bf16 %v2886_v44, %v2886_v44 }
 0x786   : > { %v2878_v49 = vpop.f32.mrf.mxu1 }
 0x787   : > { %v2895_v16 = vsel %vm2893_vm5, %v2887_v45, 0 }
 0x788   : > { %2904 = vmatpush.bf16.msrb.mxu2 %v2895_v16  ;;  %2939 = vmatpush.bf16.msrb.mxu3 %v2895_v16 }
 0x78b   : > { %4080 = vmatmul.msk.bf16.vlgmr.msrb.gmra.mxu2 %vm2889_vm6, %v2888_v50  ;;  %4082 = vmatmul.msk.bf16.vlgmr.msrb.gmra.mxu3 %vm2889_vm6, %v4081_v26 }
 0x78c   : > { %3097 = vmatpush.bf16.msra.mxu2 %v2895_v16  ;;  %3169 = vmatpush.bf16.msra.mxu3 %v4350_v48 }
 0x790   : > { %3170 = vmatpush.bf16.msra.mxu3 %v4349_v51 }
 0x794   : > { %3171 = vmatpush.bf16.msra.mxu3 %v4348_v32 }
 0x798   : > { %3172 = vmatpush.bf16.msra.mxu3 %v4347_v61 }
 0x79b   : > { %4148 = vmatmul.msk.bf16.vlgmr.msra.gmra.mxu2 %vm2889_vm6, %v4147_v52 }
 0x79c   : > { %3173 = vmatpush.bf16.msra.mxu3 %v4346_v0 }
 0x7a0   : > { %3174 = vmatpush.bf16.msra.mxu3 %v4345_v23 }
 0x7a4   : > { %3175 = vmatpush.bf16.msra.mxu3 %v4344_v1 }
 0x7a8   : > { %3176 = vmatpush.bf16.msra.mxu3 %v4343_v2 }
 0x80e   : > { %v2906_v3 = vpop.f32.mrf.mxu2  ;;  %v2941_v21 = vpop.f32.mrf.mxu3 }
 0x80f   : > { %v2910_v19 = vpack.c.bf16 %v2906_v3, %v2906_v3  ;;  %v2945_v4 = vpack.c.bf16 %v2941_v21, %v2941_v21 }
 0x811   : > { %3080 = vmatmul.bf16.vlgmr.msrb.gmra.mxu1 %v2910_v19  ;;  %3019 = vmatmul.bf16.vlgmr.msra.gmra.mxu0 %v2945_v4 }
 0x816   : > { %v2908_v25 = vpop.f32.mrf.mxu2  ;;  %v2943_v5 = vpop.f32.mrf.mxu3 }
 0x81e   : > { %v3099_v46 = vpop.f32.mrf.mxu2 }
 0x81f   : > { %v3103_v6 = vpack.c.bf16 %v3099_v46, %v3099_v46 }
 0x821   : > { %3177 = vmatmul.bf16.vlgmr.msra.gmra.mxu3 %v3103_v6 }
 0x826   : > { %v3101_v9 = vpop.f32.mrf.mxu2 }
 0x88e   : > { %v3081_v17 = vpop.f32.mrf.mxu1  ;;  %v3020_v11 = vpop.f32.mrf.mxu0 }
 0x88f   : > { %v3082_v15 = vadd.f32 %v3081_v17, %v3020_v11 }
 0x896   : > { %v3083_v14 = vpop.f32.mrf.mxu1  ;;  %v3022_v12 = vpop.f32.mrf.mxu0 }
 0x8a4   : > { %v3178_v18 = vpop.f32.mrf.mxu3 }
 0x8a5   : > { %v3182_v20 = vadd.f32 %v3178_v18, %v3082_v15 }
 0x8a7   : > { %v3187_v13 = vadd.f32 %v4478_v10, %v3182_v20 }
 0x8a9   : > { %v3188_v47 = vmax.f32 %v3187_v13, 0.0 }
 0x8ab   : > { %v3189_v22 = vpack.c.bf16 %v3188_v47, %v3188_v47 }
 0x8ac   : > { %v3180_v24 = vpop.f32.mrf.mxu3 }
 0x8ad   : > { %3190 = vst [vmem:[%s770_s23] sm:$0x1] %v3189_v22 }
 0x8ae PF: > { %s5487_s21 = sld [smem:[#allocation25_spill]] }
 0x8b4   : > { %s35_s0 = sadd.s32 1, %s5487_s21  }
 0x8b5   : > { %p32_p7 = scmp.ge.s32.totalorder %s35_s0, 4  }
 0x8b7   :  { %34 = sbr.rel (!%p32_p7) target bundleno = 15 (0xf), region = 195 }
 0x8bc   :  { %3208 = vsyncpa [#allocation3], 1 }
 0x8bd   :  { %3210 = vsyncpa [#allocation3 + $0x1], 1 }
 0x8be   :  { %3211 = vsyncpa [#allocation5], 1 }
 0x8bf   :  { %3212 = vsyncpa [#allocation8], 1 }
 0x8c0   :  { %3213 = vsyncpa [#allocation11], 1 }
 0x8c1   :  { %3214 = vsyncpa [#allocation14], 1 }
 0x8c2   :  { %3215 = vsyncpa [#allocation17], 1 }

</bundles_post_ra>
